<compile_context>
chip_gen: v7x
topology: tpu7x:2x2x1
jax: 0.10.0
libtpu: 0.0.40
codegen_flags: <defaults>
</compile_context>

<pallas_src>
import jax
import jax.numpy as jnp
from jax import lax
from jax.experimental import pallas as pl
from jax.experimental.pallas import tpu as pltpu


def _attention_kernel(scale_ref, q_ref, k_ref, v_ref, o_ref):
    # scale_ref: SMEM (1,) f32 scalar  (scale = 1 / inv_scale_factor)
    # q_ref: (TQ, D) bf16   k_ref: (S, D) bf16   v_ref: (S, D) bf16   o_ref: (TQ, D)

    # scores = q @ k^T -> (TQ, S); contract the last dim of both operands so no
    # wrapper-side key transpose is needed (MXU loads the RHS transposed).
    s = lax.dot_general(
        q_ref[...], k_ref[...],
        dimension_numbers=(((1,), (1,)), ((), ())),
        preferred_element_type=jnp.float32)

    # Numerically stable softmax of (s * scale), scale folded into the exp
    # argument (exactly equivalent for scale > 0). Stays in f32 (VPU/EUP).
    scale = scale_ref[0]
    m = jnp.max(s, axis=-1, keepdims=True)
    p = jnp.exp((s - m) * scale)
    l = jnp.sum(p, axis=-1, keepdims=True)

    # TODO(synk): nn.Dropout2d in eval mode is the identity; training-mode channel
    # dropout (fixed p=0.5, ignores dropout_p) is not reproduced here.

    # Unnormalized PV matmul (bf16 operands, f32 MXU accumulation), then normalize
    # the (TQ, D) f32 accumulator: TQ*D multiplies instead of TQ*S, and the
    # normalization is applied in f32 accumulator space.
    out = jnp.dot(p.astype(jnp.bfloat16), v_ref[...],
                  preferred_element_type=jnp.float32)
    o_ref[...] = (out * pl.reciprocal(l, approx=True)).astype(o_ref.dtype)


def attention(query, key, value, inv_scale_factor=1.0, dropout_p=0.1, *, tq=128):
    """Reproduces Model.forward (eval mode) with a Pallas TPU kernel.

    tq=128 keeps >=2 parallel grid steps at S=256 (v7x dual TensorCores), matches
    the v5e 128-wide MXU, and still feeds the 256-wide v6e/v7x MXU fine.
    """
    B, S, D = query.shape
    assert key.shape == (B, S, D) and value.shape == (B, S, D)
    assert inv_scale_factor > 0, "scale folding into exp assumes a positive scale"
    tq = min(tq, S)
    # TODO(synk): ragged S (S % tq != 0) would need a padded / masked final tile.
    assert S % tq == 0, "sequence length must be divisible by the query tile"

    # Boundary bf16 cast: the MXU operands are bf16 anyway; this halves the HBM
    # bytes DMA'd per tile and the VMEM footprint of the full-resident K/V blocks.
    q_bf = query.astype(jnp.bfloat16)
    k_bf = key.astype(jnp.bfloat16)
    v_bf = value.astype(jnp.bfloat16)
    scale = jnp.asarray([1.0 / inv_scale_factor], dtype=jnp.float32)

    grid_spec = pltpu.PrefetchScalarGridSpec(
        num_scalar_prefetch=1,                                  # scale -> SMEM
        grid=(B, S // tq),
        in_specs=[
            # Size-1 batch dim squeezed out of the kernel refs -> plain 2-D MXU dots.
            pl.BlockSpec((pl.Squeezed(), tq, D), lambda b, i, s_ref: (b, i, 0)),
            # K/V blocks are invariant across the query-tile axis -> single-buffer
            # them (default double-buffering only doubles the largest VMEM blocks).
            pl.BlockSpec((pl.Squeezed(), S, D), lambda b, i, s_ref: (b, 0, 0),
                         pipeline_mode=pl.Buffered(1)),
            pl.BlockSpec((pl.Squeezed(), S, D), lambda b, i, s_ref: (b, 0, 0),
                         pipeline_mode=pl.Buffered(1)),
        ],
        out_specs=pl.BlockSpec((pl.Squeezed(), tq, D), lambda b, i, s_ref: (b, i, 0)),
    )

    # VMEM budget: bf16 single-buffered K/V, double-buffered bf16 q / f32 o tiles,
    # f32 (TQ, S) score/prob intermediates; 2x headroom, >= 32 MiB, capped at
    # 64 MiB so the limit is valid on v7x (64 MiB physical) as well as v5e/v6e.
    kv_vmem = 2 * S * D * 2
    qo_vmem = 2 * (tq * D * 2 + tq * D * 4)
    tmp_vmem = 3 * tq * S * 4
    vmem_limit_bytes = int(min(64 << 20, max(32 << 20, 2 * (kv_vmem + qo_vmem + tmp_vmem))))

    cost = pl.CostEstimate(
        flops=4 * B * S * S * D,                       # two matmuls: 2*M*N*K each
        transcendentals=B * S * S,                     # exp in softmax
        bytes_accessed=3 * B * S * D * 2 + B * S * D * 4,  # bf16 q/k/v in, f32 out
    )

    # TODO(synk): for very long S (bf16 single-buffered K/V stops fitting around
    # S~16K at D=384 on v7x), add a K/V grid axis with an online-softmax
    # accumulator (flash-style) so VMEM stays O(tq*D) instead of O(S*D).
    return pl.pallas_call(
        _attention_kernel,
        out_shape=jax.ShapeDtypeStruct((B, S, D), query.dtype),
        grid_spec=grid_spec,
        compiler_params=pltpu.CompilerParams(
            dimension_semantics=("parallel", "parallel"),
            vmem_limit_bytes=vmem_limit_bytes),
        cost_estimate=cost,
    )(scale, q_bf, k_bf, v_bf)


def _reference_bf16(query, key, value, inv_scale_factor):
    """Same numerical recipe as the kernel (bf16 MXU operands, f32 accum/softmax)."""
    scale = jnp.float32(1.0) / jnp.float32(inv_scale_factor)
    q = query.astype(jnp.bfloat16)
    k = key.astype(jnp.bfloat16)
    v = value.astype(jnp.bfloat16)
    s = jnp.einsum("bqd,bkd->bqk", q, k, preferred_element_type=jnp.float32)
    m = jnp.max(s, axis=-1, keepdims=True)
    p = jnp.exp((s - m) * scale)
    l = jnp.sum(p, axis=-1, keepdims=True)
    out = jnp.einsum("bqk,bkd->bqd", p.astype(jnp.bfloat16), v,
                     preferred_element_type=jnp.float32)
    return (out / l).astype(query.dtype)


def _reference_f32(query, key, value, inv_scale_factor):
    """Full-f32 equivalent of the PyTorch module (eval mode)."""
    qk = jnp.einsum("bqd,bkd->bqk", query, key)
    scaled = qk / inv_scale_factor
    attn = jax.nn.softmax(scaled, axis=-1)
    return jnp.einsum("bqk,bkd->bqd", attn, value)


if __name__ == "__main__":
    # Shapes consistent with the module's example inputs: (1, 256, 384)
    B, S, D = 1, 256, 384
    inv_scale_factor = 1.0
    dropout_p = 0.1  # unused by the module (Dropout2d fixed p=0.5; eval => identity)

    k0, k1, k2 = jax.random.split(jax.random.PRNGKey(0), 3)
    query = jax.random.normal(k0, (B, S, D), dtype=jnp.float32)
    key = jax.random.normal(k1, (B, S, D), dtype=jnp.float32)
    value = jax.random.normal(k2, (B, S, D), dtype=jnp.float32)

    out = attention(query, key, value, inv_scale_factor, dropout_p)
    out = jax.block_until_ready(out)
    assert out.shape == (B, S, D)

    # Tight check against a reference using the exact same bf16-operand recipe.
    ref_bf16 = _reference_bf16(query, key, value, inv_scale_factor)
    assert jnp.allclose(out, ref_bf16, atol=5e-3, rtol=5e-3), "mismatch vs bf16 reference"

    # Loose aggregate check against the full-f32 PyTorch-equivalent math
    # (bf16 MXU operand quantization dominates this difference).
    ref_f32 = _reference_f32(query, key, value, inv_scale_factor)
    rel_err = jnp.linalg.norm(out - ref_f32) / jnp.linalg.norm(ref_f32)
    assert float(rel_err) < 5e-2, "excessive deviation vs f32 reference"

    print("KERNEL_OK")
</pallas_src>

<mosaic_0001>
module attributes {stable_mosaic.version = 11 : i64} {
  func.func @_attention_kernel(%arg0: i32, %arg1: i32, %arg2: memref<1xf32, #tpu.memory_space<smem>>, %arg3: memref<1x128x384xbf16, #tpu.memory_space<vmem>>, %arg4: memref<1x256x384xbf16, #tpu.memory_space<vmem>>, %arg5: memref<1x256x384xbf16, #tpu.memory_space<vmem>>, %arg6: memref<1x128x384xf32, #tpu.memory_space<vmem>>) attributes {dimension_semantics = [#tpu.dimension_semantics<parallel>, #tpu.dimension_semantics<parallel>], iteration_bounds = array<i64: 1, 2>, scalar_prefetch = 1 : i64, scratch_operands = 0 : i64, tpu.core_type = #tpu.core_type<tc>, window_params = [{transform_indices = @transform_0, window_bounds = array<i64: 1, 128, 384>}, {pipeline_mode = #tpu.pipeline_mode<synchronous>, transform_indices = @transform_1, window_bounds = array<i64: 1, 256, 384>}, {pipeline_mode = #tpu.pipeline_mode<synchronous>, transform_indices = @transform_2, window_bounds = array<i64: 1, 256, 384>}, {transform_indices = @transform_3, window_bounds = array<i64: 1, 128, 384>}]} {
    %c0 = arith.constant 0 : index
    %c0_0 = arith.constant 0 : index
    %c0_1 = arith.constant 0 : index
    %0 = vector.load %arg3[%c0, %c0_0, %c0_1] : memref<1x128x384xbf16, #tpu.memory_space<vmem>>, vector<1x128x384xbf16>
    %1 = vector.shape_cast %0 : vector<1x128x384xbf16> to vector<128x384xbf16>
    %c0_2 = arith.constant 0 : index
    %c0_3 = arith.constant 0 : index
    %c0_4 = arith.constant 0 : index
    %2 = vector.load %arg4[%c0_2, %c0_3, %c0_4] : memref<1x256x384xbf16, #tpu.memory_space<vmem>>, vector<1x256x384xbf16>
    %3 = vector.shape_cast %2 : vector<1x256x384xbf16> to vector<256x384xbf16>
    %cst = arith.constant dense<0.000000e+00> : vector<128x256xf32>
    %4 = tpu.matmul %1, %3, %cst {dimension_numbers = #tpu.dot_dimension_numbers<[1], [1], [0], [0], [0, 0, 1, 0], [], []>} : vector<128x384xbf16>, vector<256x384xbf16>, vector<128x256xf32> -> vector<128x256xf32>
    %c0_5 = arith.constant 0 : index
    %5 = memref.load %arg2[%c0_5] : memref<1xf32, #tpu.memory_space<smem>>
    %cst_6 = arith.constant dense<0xFF800000> : vector<128xf32>
    %6 = vector.multi_reduction <maximumf>, %4, %cst_6 [1] : vector<128x256xf32> to vector<128xf32>
    %7 = vector.shape_cast %6 : vector<128xf32> to vector<128x1xf32>
    %8 = vector.broadcast %7 : vector<128x1xf32> to vector<128x256xf32>
    %9 = arith.subf %4, %8 : vector<128x256xf32>
    %10 = vector.broadcast %5 : f32 to vector<128x256xf32>
    %11 = arith.mulf %9, %10 : vector<128x256xf32>
    %12 = math.exp %11 : vector<128x256xf32>
    %cst_7 = arith.constant dense<0.000000e+00> : vector<128xf32>
    %13 = vector.multi_reduction <add>, %12, %cst_7 [1] : vector<128x256xf32> to vector<128xf32>
    %14 = vector.shape_cast %13 : vector<128xf32> to vector<128x1xf32>
    %15 = arith.truncf %12 : vector<128x256xf32> to vector<128x256xbf16>
    %c0_8 = arith.constant 0 : index
    %c0_9 = arith.constant 0 : index
    %c0_10 = arith.constant 0 : index
    %16 = vector.load %arg5[%c0_8, %c0_9, %c0_10] : memref<1x256x384xbf16, #tpu.memory_space<vmem>>, vector<1x256x384xbf16>
    %17 = vector.shape_cast %16 : vector<1x256x384xbf16> to vector<256x384xbf16>
    %cst_11 = arith.constant dense<0.000000e+00> : vector<128x384xf32>
    %18 = tpu.matmul %15, %17, %cst_11 {dimension_numbers = #tpu.dot_dimension_numbers<[1], [0], [0], [1], [0, 0, 1, 1], [], []>} : vector<128x256xbf16>, vector<256x384xbf16>, vector<128x384xf32> -> vector<128x384xf32>
    %19 = tpu.reciprocal %14 {approx = true} : vector<128x1xf32> -> vector<128x1xf32>
    %20 = vector.broadcast %19 : vector<128x1xf32> to vector<128x384xf32>
    %21 = arith.mulf %18, %20 : vector<128x384xf32>
    %c0_12 = arith.constant 0 : index
    %c0_13 = arith.constant 0 : index
    %c0_14 = arith.constant 0 : index
    %22 = vector.load %arg6[%c0_12, %c0_13, %c0_14] : memref<1x128x384xf32, #tpu.memory_space<vmem>>, vector<1x128x384xf32>
    %23 = vector.shape_cast %22 : vector<1x128x384xf32> to vector<128x384xf32>
    %24 = vector.shape_cast %21 : vector<128x384xf32> to vector<1x128x384xf32>
    tpu.vector_store %arg6[%c0_12, %c0_13, %c0_14], %24 {strides = array<i32>} : memref<1x128x384xf32, #tpu.memory_space<vmem>>, vector<1x128x384xf32>,
    return
  }
  func.func @transform_0(%arg0: i32, %arg1: i32, %arg2: memref<1xf32, #tpu.memory_space<smem>>) -> (i32, i32, i32) {
    %c0_i32 = arith.constant 0 : i32
    %c0_i32_0 = arith.constant 0 : i32
    return %arg0, %arg1, %c0_i32 : i32, i32, i32
  }
  func.func @transform_1(%arg0: i32, %arg1: i32, %arg2: memref<1xf32, #tpu.memory_space<smem>>) -> (i32, i32, i32) {
    %c0_i32 = arith.constant 0 : i32
    %c0_i32_0 = arith.constant 0 : i32
    %c0_i32_1 = arith.constant 0 : i32
    return %arg0, %c0_i32, %c0_i32_0 : i32, i32, i32
  }
  func.func @transform_2(%arg0: i32, %arg1: i32, %arg2: memref<1xf32, #tpu.memory_space<smem>>) -> (i32, i32, i32) {
    %c0_i32 = arith.constant 0 : i32
    %c0_i32_0 = arith.constant 0 : i32
    %c0_i32_1 = arith.constant 0 : i32
    return %arg0, %c0_i32, %c0_i32_0 : i32, i32, i32
  }
  func.func @transform_3(%arg0: i32, %arg1: i32, %arg2: memref<1xf32, #tpu.memory_space<smem>>) -> (i32, i32, i32) {
    %c0_i32 = arith.constant 0 : i32
    %c0_i32_0 = arith.constant 0 : i32
    return %arg0, %arg1, %c0_i32 : i32, i32, i32
  }
}

</mosaic_0001>

<bundles_post_ra>
// kernel: tpu_custom_call.1
= control target key start
LH: loop header
LB: loop body
LE: loop exit
PB: predicated region body
PF: predicated region fallthrough
CT: control target
= control target key end

     0   :  { %s3420_s0 = inlined_call_operand.<no memory space> [shape: f32[1], index: 0, kind: input, shape index: {}]   ;;  %s3421_s1 = inlined_call_operand.hbm [shape: bf16[1,256,384], index: 1, kind: input, shape index: {}]   ;;  %s3422_s2 = inlined_call_operand.hbm [shape: bf16[1,256,384], index: 2, kind: input, shape index: {}]   ;;  %s3423_s3 = inlined_call_operand.hbm [shape: bf16[1,256,384], index: 3, kind: input, shape index: {}]   ;;  %s3424_s4 = inlined_call_operand.hbm [shape: f32[1,256,384], index: 4, kind: output, shape index: {}]  }
   0x1   :  { %9 = sst [smem:[#allocation3]] %s3420_s0 }
   0x2   :  { %10 = vsyncpa [#allocation5], 0 }
   0x3   :  { %12 = vsyncpa [#allocation5 + $0x1], 0 }
   0x4   :  { %13 = vsyncpa [#allocation8], 0 }
   0x5   :  { %14 = vsyncpa [#allocation6], 0 }
   0x6   :  { %16 = vsyncpa [#allocation6 + $0x1], 0  ;;  %s2798_s17 = smov 0   ;;  %s2800_s18 = smov 0  }
   0x7   :  { %s2802_s19 = smov 0   ;;  %s2804_s20 = smov 0  }
   0x8   :  { %s2806_s21 = smov 0   ;;  %s2808_s22 = smov 0  }
   0x9 LB: > { %s1975_s0 = sadd.s32 4294967295, %s2760_s22   ;;  %s1976_s23 = sadd.s32 4294967294, %s2760_s22   ;;  %s2760_s22 = sphi %s2808_s22, %s22_s22   ;;  %s2756_s21 = sphi %s2806_s21, %s3446_s21   ;;  %s2752_s20 = sphi %s2804_s20, %s3445_s20   ;;  %s2748_s19 = sphi %s2802_s19, %s3444_s19   ;;  %s2744_s18 = sphi %s2800_s18, %s3443_s18   ;;  %s2740_s17 = sphi %s2798_s17, %s3442_s17  }
   0xa   : > { %p56_p0 = scmp.ne.s32.totalorder %s2744_s18, %s2740_s17  ;;  %p2832_p1 = scmp.eq.s32.totalorder %s1975_s0, 0 }
   0xb   : > { %p2836_p2 = scmp.eq.s32.totalorder %s1975_s0, 1  ;;  %p140_p3 = scmp.eq.s32.totalorder %s1976_s23, 1 }
   0xc   : > { %s3429_s24 = scalar_select %p2832_p1, 1, 0 }
   0xd   : > { %p2842_p4 = por %p2832_p1, %p56_p0  ;;  %p1977_p5 = scmp.ge.s32.totalorder %s2760_s22, 1 }
   0xe   : > { %p2847_p6 = por %p140_p3, %p56_p0  ;;  %p147_p7 = scmp.lt.s32.totalorder %s2760_s22, 3 }
   0xf   : > { %s3431_s26 = scalar_select %p2842_p4, 1, 0 }
  0x10   : > { %s3432_s27 = scalar_select %p2847_p6, 1, 0 }
  0x11   : > { %p2852_p8 = pnand %p1977_p5, %p147_p7  ;;  %s2762_s29 = smov [#allocation7]  }
  0x12   : > { %s162_s30 = sshll.u32 %s2762_s29, 4  ;;  %s2763_s6 = smov [#allocation9]   ;;  %s2856_s30 = int_to_ptr.vmem [resolvable:$true] %s162_s30 }
  0x13   : > { %p2257_p9 = pneg %p2852_p8  ;;  %s178_s7 = sshll.u32 %s2763_s6, 4  ;;  %s2867_s7 = int_to_ptr.vmem [resolvable:$true] %s178_s7 }
  0x14   : > { %s2588_s10 = scalar_lea.hbm %s3422_s2, 6144 }
  0x15   : > { %p2863_p11 = pnand %p2257_p9, %p2832_p1  ;;  %p2589_p12 = scmp.ne.s32.totalorder %s3422_s2, %s2588_s10 }
  0x16   : > { %p2595_p5 = scmp.lt.u32.totalorder %s2588_s10, %s3422_s2 }
  0x17   : > { %p2590_p13 = pneg %p2863_p11 }
  0x19   : > { %p2591_p0 = pnand %p2590_p13, %p2589_p12 }
  0x1b   : > { %p2592_p3 = pneg %p2591_p0 }
  0x1d   : > { %p2597_p7 = pnand %p2595_p5, %p2592_p3 }
  0x1f   : > { %2600 = shalt.err (!%p2597_p7)
}
  0x20   : > { %s2601_s15 = scalar_lea.vmem %s2856_s30, 6144  ;;  %p2609_p1 = scmp.lt.s32.totalorder %s2856_s30, %s2856_s30 }
  0x21   : > { %p2602_p9 = scmp.ne.s32.totalorder %s2856_s30, %s2601_s15  ;;  %p2610_p12 = scmp.lt.s32.totalorder %s2601_s15, %s2601_s15 }
  0x23   : > { %p2604_p10 = pnand %p2602_p9, %p2590_p13  ;;  %p2611_p0 = por %p2610_p12, %p2609_p1 }
  0x25   : > { %p2605_p6 = pneg %p2604_p10 }
  0x27   : > { %p2612_p4 = pnand %p2611_p0, %p2605_p6 }
  0x29   : > { %2615 = shalt.err (!%p2612_p4)
}
  0x2a   : > { %s2764_s16 = smov 192   ;;  %s2765_s0 = smov 12  }
  0x2b   : > { %2260 = dma.hbm_to_vmem [thread:$0]  (!%p2863_p11), %s3422_s2, 6144, %s2856_s30, [#allocation8], %s2764_s16, %s2764_s16, %s2765_s0  }
  0x2c   : > { %s2616_s9 = scalar_lea.hbm %s3423_s3, 6144 }
  0x2d   : > { %p2617_p1 = scmp.ne.s32.totalorder %s3423_s3, %s2616_s9  ;;  %p2623_p10 = scmp.lt.u32.totalorder %s2616_s9, %s3423_s3 }
  0x2f   : > { %p2619_p4 = pnand %p2617_p1, %p2590_p13 }
  0x31   : > { %p2620_p6 = pneg %p2619_p4 }
  0x33   : > { %p2625_p3 = pnand %p2623_p10, %p2620_p6 }
  0x35   : > { %2628 = shalt.err (!%p2625_p3)
}
  0x36   : > { %s2629_s30 = scalar_lea.vmem %s2867_s7, 6144  ;;  %p2637_p12 = scmp.lt.s32.totalorder %s2867_s7, %s2867_s7 }
  0x37   : > { %p2630_p5 = scmp.ne.s32.totalorder %s2867_s7, %s2629_s30  ;;  %p2638_p0 = scmp.lt.s32.totalorder %s2629_s30, %s2629_s30 }
  0x39   : > { %p2632_p7 = pnand %p2630_p5, %p2590_p13  ;;  %p2639_p1 = por %p2638_p0, %p2637_p12 }
  0x3b   : > { %p2633_p9 = pneg %p2632_p7 }
  0x3d   : > { %p2640_p4 = pnand %p2639_p1, %p2633_p9 }
  0x3f   : > { %2643 = shalt.err (!%p2640_p4)
}
  0x40   : > { %2263 = dma.hbm_to_vmem [thread:$0]  (!%p2863_p11), %s3423_s3, 6144, %s2867_s7, [#allocation8], %s2764_s16, %s2764_s16, %s2765_s0  }
  0x41   : > { %s31_s5 = sadd.s32 1, %s2756_s21  ;;  %s43_s23 = sadd.s32 1, %s2748_s19 }
  0x42   : > { %p32_p13 = scmp.ge.s32.totalorder %s31_s5, 2  ;;  %p50_p6 = scmp.ne.s32.totalorder %s2748_s19, %s2744_s18 }
  0x43   : > { %p51_p10 = scmp.eq.s32.totalorder %s2760_s22, 0  ;;  %p2274_p3 = scmp.lt.s32.totalorder %s2760_s22, 2 }
  0x44   : > { %s3448_s5 = smov (%p32_p13, %s31_s5), 0  ;;  %p2937_p7 = por %p2836_p2, %p50_p6 }
  0x45   : > { %p52_p5 = por %p51_p10, %p50_p6  ;;  %s39_s6 = ssub.s32 %s2756_s21, %s3448_s5 }
  0x46   : > { %s3435_s29 = scalar_select %p2937_p7, 1, 0 }
  0x47   : > { %s192_s8 = sand.u32 1, %s2748_s19   ;;  %p41_p9 = scmp.eq.s32.totalorder %s39_s6, 0 }
  0x48   : > { %s2240_s7 = smul.u32 192, %s192_s8  ;;  %p2944_p11 = pnand %p2274_p3, %p52_p5 }
  0x49   : > { %s2949_s10 = scalar_select %p41_p9, %s2748_s19, %s43_s23  }
  0x4a   : > { %s2241_s11 = smul.u32 3072, %s2756_s21  ;;  %s196_s12 = scalar_lea.vmem [#allocation4], %s2240_s7 }
  0x4b   : > { %s206_s13 = sshll.u32 %s196_s12, 4  ;;  %s2959_s15 = scalar_lea.sflag [#allocation5], %s192_s8  ;;  %s2957_s13 = int_to_ptr.vmem [resolvable:$true] %s206_s13 }
  0x4c   : > { %s2955_s14 = scalar_lea.hbm %s3421_s1, %s2241_s11  ;;  %p2646_p12 = pneg %p2944_p11 }
  0x4d   : > { %s2644_s6 = scalar_lea.hbm %s2955_s14, 3072  ;;  %s2649_s11 = scalar_lea.hbm %s3421_s1, 6144 }
  0x4e   : > { %p2645_p2 = scmp.ne.s32.totalorder %s2955_s14, %s2644_s6  ;;  %p2650_p4 = scmp.lt.u32.totalorder %s2955_s14, %s3421_s1 }
  0x4f   : > { %p2651_p13 = scmp.lt.u32.totalorder %s2649_s11, %s2644_s6  ;;  %p2653_p10 = scmp.lt.u32.totalorder %s2644_s6, %s2955_s14 }
  0x50   : > { %p2647_p0 = pnand %p2646_p12, %p2645_p2 }
  0x51   : > { %p2652_p6 = por %p2651_p13, %p2650_p4 }
  0x52   : > { %p2648_p1 = pneg %p2647_p0 }
  0x53   : > { %p2654_p3 = por %p2653_p10, %p2652_p6 }
  0x55   : > { %p2655_p5 = pnand %p2654_p3, %p2648_p1 }
  0x57   : > { %2658 = shalt.err (!%p2655_p5)
}
  0x58   : > { %s2659_s8 = scalar_lea.vmem %s2957_s13, 3072  ;;  %s2766_s30 = smov [#allocation4]  }
  0x59   : > { %p2660_p9 = scmp.ne.s32.totalorder %s2957_s13, %s2659_s8  ;;  %s2664_s23 = sshll.u32 %s2766_s30, 4  ;;  %s2665_s23 = int_to_ptr.vmem [resolvable:$false] %s2664_s23 }
  0x5a   : > { %s2666_s7 = scalar_lea.vmem %s2665_s23, 6144  ;;  %p2667_p7 = scmp.lt.s32.totalorder %s2957_s13, %s2665_s23 }
  0x5b   : > { %p2662_p2 = pnand %p2660_p9, %p2646_p12  ;;  %p2668_p4 = scmp.lt.s32.totalorder %s2666_s7, %s2659_s8 }
  0x5d   : > { %p2663_p0 = pneg %p2662_p2  ;;  %p2669_p13 = por %p2668_p4, %p2667_p7 }
  0x5f   : > { %p2670_p6 = pnand %p2669_p13, %p2663_p0 }
  0x61   : > { %2673 = shalt.err (!%p2670_p6)
}
  0x62   : > { %2267 = dma.hbm_to_vmem [thread:$0]  (!%p2944_p11), %s2955_s14, 3072, %s2957_s13, %s2959_s15, %s2764_s16, %s2764_s16, %s2765_s0  }
  0x63   : > { %218 = sbr.rel (%p2852_p8) target bundleno = 1039 (0x40f), region = 32  ;;  %s2993_s6 = sand.u32 (!%p2852_p8), 1, %s2744_s18  }
  0x64   : > { %s2242_s11 = smul.u32 (!%p2852_p8), 192, %s2993_s6  ;;  %s221_s12 = scalar_lea.sflag (!%p2852_p8), [#allocation5], %s2993_s6 }
  0x65   : > { %p3437_p7 = scmp.ne.s32.totalorder (!%p2852_p8), %s3431_s26, 0 }
  0x66   : > { %s2997_s25 = scalar_lea.vmem (!%p2852_p8), [#allocation4], %s2242_s11 }
  0x6a   : > { %2727 = dma.done.wait (%p3437_p7), %s221_s12, 3072  }
  0x6b   : > { %2729 = vsyncadd (%p3437_p7), %s221_s12, 4294964224  ;;  %p3438_p11 = scmp.ne.s32.totalorder %s3429_s24, 0 }
  0x6d   : > { %2731 = dma.done.wait (%p3438_p11), [#allocation8], 12288  }
  0x6e   : > { %2733 = vsyncadd (%p3438_p11), [#allocation8], 4294955008  ;;  %v2332_v0 = vld [vmem:[#allocation7 + $0x4] ss:$12 sps:$4 sm:$0xff]   ;;  %v2334_v1 = vld [vmem:[#allocation7] ss:$12 sps:$4 sm:$0xff]  }
  0x6f   : > { %738 = vmatprep.subr.bf16.mxu0 %v2332_v0  ;;  %v2335_v2 = vld [vmem:[#allocation7 + $0x1c] ss:$12 sps:$4 sm:$0xff]   ;;  %v2337_v3 = vld [vmem:[#allocation7 + $0x18] ss:$12 sps:$4 sm:$0xff]   ;;  %v2338_v4 = vld [vmem:[#allocation7 + $0x34] ss:$12 sps:$4 sm:$0xff]  }
  0x70   : > { %739 = vmatpush1.bf16.xpose.msra.mxu0 %v2334_v1  ;;  %v2340_v5 = vld [vmem:[#allocation7 + $0x30] ss:$12 sps:$4 sm:$0xff]   ;;  %v2341_v6 = vld [vmem:[#allocation7 + $0x4c] ss:$12 sps:$4 sm:$0xff]   ;;  %v2343_v8 = vld [vmem:[#allocation7 + $0x48] ss:$12 sps:$4 sm:$0xff]  }
  0x71   : > { %740 = vmatprep.subr.bf16.mxu0 %v2335_v2  ;;  %v2382_v7 = vld [vmem:[%s2997_s25 + $0x4] ss:$12 sps:$4 sm:$0xff]   ;;  %v2346_v10 = vld [vmem:[#allocation7 + $0x60] ss:$12 sps:$4 sm:$0xff]   ;;  %v2347_v11 = vld [vmem:[#allocation7 + $0x7c] ss:$12 sps:$4 sm:$0xff]  }
  0x72   : > { %v2344_v9 = vld [vmem:[#allocation7 + $0x64] ss:$12 sps:$4 sm:$0xff]   ;;  %770 = vmatprep.mubr.bf16.mxu0 %v2382_v7  ;;  %v2350_v13 = vld [vmem:[#allocation7 + $0x94] ss:$12 sps:$4 sm:$0xff]   ;;  %v2353_v15 = vld [vmem:[#allocation7 + $0xac] ss:$12 sps:$4 sm:$0xff]  }
  0x73   : > { %v2349_v12 = vld [vmem:[#allocation7 + $0x78] ss:$12 sps:$4 sm:$0xff]   ;;  %v2352_v14 = vld [vmem:[#allocation7 + $0x90] ss:$12 sps:$4 sm:$0xff]   ;;  %v2355_v16 = vld [vmem:[#allocation7 + $0xa8] ss:$12 sps:$4 sm:$0xff]  }
  0x74   : > { %v2356_v17 = vld [vmem:[#allocation7 + $0xc4] ss:$12 sps:$4 sm:$0xff]   ;;  %v2358_v18 = vld [vmem:[#allocation7 + $0xc0] ss:$12 sps:$4 sm:$0xff]   ;;  %v2359_v19 = vld [vmem:[#allocation7 + $0xdc] ss:$12 sps:$4 sm:$0xff]  }
  0x75   : > { %v2361_v20 = vld [vmem:[#allocation7 + $0xd8] ss:$12 sps:$4 sm:$0xff]   ;;  %v2362_v21 = vld [vmem:[#allocation7 + $0xf4] ss:$12 sps:$4 sm:$0xff]   ;;  %v2364_v22 = vld [vmem:[#allocation7 + $0xf0] ss:$12 sps:$4 sm:$0xff]  }
  0x76   : > { %v2365_v23 = vld [vmem:[#allocation7 + $0x10c] ss:$12 sps:$4 sm:$0xff]   ;;  %v2367_v24 = vld [vmem:[#allocation7 + $0x108] ss:$12 sps:$4 sm:$0xff]   ;;  %v2368_v25 = vld [vmem:[#allocation7 + $0x124] ss:$12 sps:$4 sm:$0xff]  }
  0x77   : > { %v2370_v26 = vld [vmem:[#allocation7 + $0x120] ss:$12 sps:$4 sm:$0xff]   ;;  %v2371_v27 = vld [vmem:[#allocation7 + $0x13c] ss:$12 sps:$4 sm:$0xff]   ;;  %v2373_v28 = vld [vmem:[#allocation7 + $0x138] ss:$12 sps:$4 sm:$0xff]  }
  0x78   : > { %741 = vmatpush1.bf16.xpose.msra.mxu0 %v2337_v3  ;;  %v2374_v29 = vld [vmem:[#allocation7 + $0x154] ss:$12 sps:$4 sm:$0xff]   ;;  %v2376_v30 = vld [vmem:[#allocation7 + $0x150] ss:$12 sps:$4 sm:$0xff]   ;;  %v2377_v31 = vld [vmem:[#allocation7 + $0x16c] ss:$12 sps:$4 sm:$0xff]  }
  0x79   : > { %742 = vmatprep.subr.bf16.mxu0 %v2338_v4  ;;  %v2379_v32 = vld [vmem:[#allocation7 + $0x168] ss:$12 sps:$4 sm:$0xff]   ;;  %v2380_v34 = vld [vmem:[%s2997_s25] ss:$12 sps:$4 sm:$0xff]   ;;  %v2387_v38 = vld [vmem:[%s2997_s25 + $0x18] ss:$12 sps:$4 sm:$0xff]  }
  0x7a   : > { %v2383_v33 = vld [vmem:[#allocation7 + $0xc8] ss:$12 sps:$4 sm:$0xff]   ;;  %v2388_v37 = vld [vmem:[#allocation7 + $0xe0] ss:$12 sps:$4 sm:$0xff]   ;;  %v2393_v41 = vld [vmem:[#allocation7 + $0xf8] ss:$12 sps:$4 sm:$0xff]  }
  0x7b   : > { %v2384_v35 = vld [vmem:[#allocation7 + $0x8] ss:$12 sps:$4 sm:$0xff]   ;;  %v2389_v39 = vld [vmem:[#allocation7 + $0x20] ss:$12 sps:$4 sm:$0xff]   ;;  %v2392_v42 = vld [vmem:[%s2997_s25 + $0x30] ss:$12 sps:$4 sm:$0xff]  }
  0x7c   : > { %v2385_v36 = vld [vmem:[%s2997_s25 + $0x1c] ss:$12 sps:$4 sm:$0xff]   ;;  %v2390_v40 = vld [vmem:[%s2997_s25 + $0x34] ss:$12 sps:$4 sm:$0xff]   ;;  %v2394_v43 = vld [vmem:[#allocation7 + $0x38] ss:$12 sps:$4 sm:$0xff]  }
  0x7d   : > { %v2395_v44 = vld [vmem:[%s2997_s25 + $0x4c] ss:$12 sps:$4 sm:$0xff]   ;;  %v2398_v45 = vld [vmem:[#allocation7 + $0x110] ss:$12 sps:$4 sm:$0xff]   ;;  %v2397_v46 = vld [vmem:[%s2997_s25 + $0x48] ss:$12 sps:$4 sm:$0xff]  }
  0x7e   : > { %v2399_v47 = vld [vmem:[#allocation7 + $0x50] ss:$12 sps:$4 sm:$0xff]   ;;  %v2403_v49 = vld [vmem:[#allocation7 + $0x128] ss:$12 sps:$4 sm:$0xff]   ;;  %v2402_v50 = vld [vmem:[%s2997_s25 + $0x60] ss:$12 sps:$4 sm:$0xff]  }
  0x7f   : > { %v2400_v48 = vld [vmem:[%s2997_s25 + $0x64] ss:$12 sps:$4 sm:$0xff]   ;;  %v2404_v51 = vld [vmem:[#allocation7 + $0x68] ss:$12 sps:$4 sm:$0xff]   ;;  %v2408_v53 = vld [vmem:[#allocation7 + $0x140] ss:$12 sps:$4 sm:$0xff]  }
  0x80   : > { %743 = vmatpush1.bf16.xpose.msra.mxu0 %v2340_v5  ;;  %v2405_v52 = vld [vmem:[%s2997_s25 + $0x7c] ss:$12 sps:$4 sm:$0xff]   ;;  %v2407_v54 = vld [vmem:[%s2997_s25 + $0x78] ss:$12 sps:$4 sm:$0xff]   ;;  %v2409_v55 = vld [vmem:[#allocation7 + $0x80] ss:$12 sps:$4 sm:$0xff]  }
  0x81   : > { %744 = vmatprep.subr.bf16.mxu0 %v2341_v6  ;;  %v2410_v56 = vld [vmem:[%s2997_s25 + $0x94] ss:$12 sps:$4 sm:$0xff]   ;;  %v2413_v57 = vld [vmem:[#allocation7 + $0x158] ss:$12 sps:$4 sm:$0xff]   ;;  %v2412_v58 = vld [vmem:[%s2997_s25 + $0x90] ss:$12 sps:$4 sm:$0xff]  }
  0x82   : > { %v2414_v59 = vld [vmem:[#allocation7 + $0x98] ss:$12 sps:$4 sm:$0xff]   ;;  %v2418_v61 = vld [vmem:[#allocation7 + $0x170] ss:$12 sps:$4 sm:$0xff]   ;;  %v2417_v62 = vld [vmem:[%s2997_s25 + $0xa8] ss:$12 sps:$4 sm:$0xff]  }
  0x83   : > { %v2415_v60 = vld [vmem:[%s2997_s25 + $0xac] ss:$12 sps:$4 sm:$0xff]   ;;  %v2419_v63 = vld [vmem:[#allocation7 + $0xb0] ss:$12 sps:$4 sm:$0xff]   ;;  %v2420_v0 = vld [vmem:[%s2997_s25 + $0x8] ss:$12 sps:$4 sm:$0xff]  }
  0x84   : > { %v2421_v1 = vld [vmem:[%s2997_s25 + $0x20] ss:$12 sps:$4 sm:$0xff]   ;;  %v2422_v2 = vld [vmem:[%s2997_s25 + $0x38] ss:$12 sps:$4 sm:$0xff]   ;;  %v2423_v3 = vld [vmem:[%s2997_s25 + $0x50] ss:$12 sps:$4 sm:$0xff]  }
  0x85   : > { %v2424_v4 = vld [vmem:[%s2997_s25 + $0x68] ss:$12 sps:$4 sm:$0xff]   ;;  %v2425_v5 = vld [vmem:[%s2997_s25 + $0x80] ss:$12 sps:$4 sm:$0xff]   ;;  %v2426_v6 = vld [vmem:[%s2997_s25 + $0x98] ss:$12 sps:$4 sm:$0xff]  }
  0x86   : > { %v2427_v7 = vld [vmem:[%s2997_s25 + $0xb0] ss:$12 sps:$4 sm:$0xff]   ;;  %s964_s24 = sld [smem:[#allocation3]]  ;;  %s2243_s26 = smul.u32 384, %s2993_s6 }
  0x87   : > { %s2244_s16 = smul.u32 6144, %s2752_s20  ;;  %s1849_s20 = scalar_lea.sflag [#allocation6], %s2993_s6 }
  0x88   : > { %745 = vmatpush1.bf16.xpose.msra.mxu0 %v2343_v8  ;;  %v2428_v8 = vld [vmem:[#allocation9 + $0x4] ss:$12 sps:$4 sm:$0xff]   ;;  %s3240_s28 = scalar_lea.vmem [#allocation10], %s2243_s26  ;;  %p3439_p12 = scmp.ne.s32.totalorder %s3435_s29, 0 }
  0x89   : > { %746 = vmatprep.subr.bf16.mxu0 %v2344_v9  ;;  %v2430_v9 = vld [vmem:[#allocation9] ss:$12 sps:$4 sm:$0xff]   ;;  %1526 = vmatprep.subr.bf16.mxu1 %v2428_v8  ;;  %s1865_s0 = sshll.u32 %s3240_s28, 4  ;;  %s3366_s14 = scalar_lea.hbm %s3424_s4, %s2244_s16  ;;  %s3368_s0 = int_to_ptr.vmem [resolvable:$true] %s1865_s0 }
  0x8a   : > { %1527 = vmatpush1.bf16.msra.mxu1 %v2430_v9  ;;  %s2674_s15 = scalar_lea.vmem %s3368_s0, 6144  ;;  %s2767_s8 = smov [#allocation10]  }
  0x8b   : > { %p2675_p8 = scmp.ne.s32.totalorder %s3368_s0, %s2674_s15  ;;  %s2678_s30 = sshll.u32 %s2767_s8, 4  ;;  %s2679_s30 = int_to_ptr.vmem [resolvable:$false] %s2678_s30 }
  0x8c   : > { %s2680_s23 = scalar_lea.vmem %s2679_s30, 12288  ;;  %p2681_p3 = scmp.lt.s32.totalorder %s3368_s0, %s2679_s30 }
  0x8d   : > { %p2676_p1 = pnand %p2675_p8, %p3439_p12  ;;  %p2682_p5 = scmp.lt.s32.totalorder %s2680_s23, %s2674_s15 }
  0x8f   : > { %p2677_p10 = pneg %p2676_p1  ;;  %p2683_p9 = por %p2682_p5, %p2681_p3 }
  0x90   : > { %747 = vmatpush1.bf16.xpose.msra.mxu0 %v2346_v10  ;;  %v2431_v10 = vld [vmem:[#allocation9 + $0x1c] ss:$12 sps:$4 sm:$0xff]  }
  0x91   : > { %748 = vmatprep.subr.bf16.mxu0 %v2347_v11  ;;  %v2433_v11 = vld [vmem:[#allocation9 + $0x18] ss:$12 sps:$4 sm:$0xff]   ;;  %1528 = vmatprep.subr.bf16.mxu1 %v2431_v10  ;;  %p2684_p2 = pnand %p2683_p9, %p2677_p10 }
  0x92   : > { %1529 = vmatpush1.bf16.msra.mxu1 %v2433_v11 }
  0x98   : > { %749 = vmatpush1.bf16.xpose.msra.mxu0 %v2349_v12  ;;  %v2434_v12 = vld [vmem:[#allocation9 + $0x34] ss:$12 sps:$4 sm:$0xff]  }
  0x99   : > { %750 = vmatprep.subr.bf16.mxu0 %v2350_v13  ;;  %v2436_v13 = vld [vmem:[#allocation9 + $0x30] ss:$12 sps:$4 sm:$0xff]   ;;  %1530 = vmatprep.subr.bf16.mxu1 %v2434_v12 }
  0x9a   : > { %1531 = vmatpush1.bf16.msra.mxu1 %v2436_v13 }
  0xa0   : > { %751 = vmatpush1.bf16.xpose.msra.mxu0 %v2352_v14  ;;  %v2437_v14 = vld [vmem:[#allocation9 + $0x4c] ss:$12 sps:$4 sm:$0xff]  }
  0xa1   : > { %752 = vmatprep.subr.bf16.mxu0 %v2353_v15  ;;  %v2439_v15 = vld [vmem:[#allocation9 + $0x48] ss:$12 sps:$4 sm:$0xff]   ;;  %1532 = vmatprep.subr.bf16.mxu1 %v2437_v14 }
  0xa2   : > { %1533 = vmatpush1.bf16.msra.mxu1 %v2439_v15  ;;  %v2476_v14 = vld [vmem:[#allocation9 + $0xc8] ss:$12 sps:$4 sm:$0xff]  }
  0xa8   : > { %753 = vmatpush1.bf16.xpose.msra.mxu0 %v2355_v16  ;;  %v2440_v16 = vld [vmem:[#allocation9 + $0x64] ss:$12 sps:$4 sm:$0xff]  }
  0xa9   : > { %754 = vmatprep.subr.bf16.mxu0 %v2356_v17  ;;  %v2442_v17 = vld [vmem:[#allocation9 + $0x60] ss:$12 sps:$4 sm:$0xff]   ;;  %1534 = vmatprep.subr.bf16.mxu1 %v2440_v16 }
  0xaa   : > { %1535 = vmatpush1.bf16.msra.mxu1 %v2442_v17 }
  0xb0   : > { %755 = vmatpush1.bf16.xpose.msra.mxu0 %v2358_v18  ;;  %v2443_v18 = vld [vmem:[#allocation9 + $0x7c] ss:$12 sps:$4 sm:$0xff]  }
  0xb1   : > { %756 = vmatprep.subr.bf16.mxu0 %v2359_v19  ;;  %v2445_v19 = vld [vmem:[#allocation9 + $0x78] ss:$12 sps:$4 sm:$0xff]   ;;  %1536 = vmatprep.subr.bf16.mxu1 %v2443_v18 }
  0xb2   : > { %1537 = vmatpush1.bf16.msra.mxu1 %v2445_v19 }
  0xb8   : > { %757 = vmatpush1.bf16.xpose.msra.mxu0 %v2361_v20  ;;  %v2446_v20 = vld [vmem:[#allocation9 + $0x94] ss:$12 sps:$4 sm:$0xff]  }
  0xb9   : > { %758 = vmatprep.subr.bf16.mxu0 %v2362_v21  ;;  %v2448_v21 = vld [vmem:[#allocation9 + $0x90] ss:$12 sps:$4 sm:$0xff]   ;;  %1538 = vmatprep.subr.bf16.mxu1 %v2446_v20 }
  0xba   : > { %1539 = vmatpush1.bf16.msra.mxu1 %v2448_v21 }
  0xc0   : > { %759 = vmatpush1.bf16.xpose.msra.mxu0 %v2364_v22  ;;  %v2449_v22 = vld [vmem:[#allocation9 + $0xac] ss:$12 sps:$4 sm:$0xff]  }
  0xc1   : > { %760 = vmatprep.subr.bf16.mxu0 %v2365_v23  ;;  %v2451_v23 = vld [vmem:[#allocation9 + $0xa8] ss:$12 sps:$4 sm:$0xff]   ;;  %1540 = vmatprep.subr.bf16.mxu1 %v2449_v22 }
  0xc2   : > { %1541 = vmatpush1.bf16.msra.mxu1 %v2451_v23 }
  0xc8   : > { %761 = vmatpush1.bf16.xpose.msra.mxu0 %v2367_v24  ;;  %v2452_v24 = vld [vmem:[#allocation9 + $0xc4] ss:$12 sps:$4 sm:$0xff]  }
  0xc9   : > { %762 = vmatprep.subr.bf16.mxu0 %v2368_v25  ;;  %v2454_v25 = vld [vmem:[#allocation9 + $0xc0] ss:$12 sps:$4 sm:$0xff]   ;;  %1542 = vmatprep.subr.bf16.mxu1 %v2452_v24 }
  0xca   : > { %1543 = vmatpush1.bf16.msra.mxu1 %v2454_v25  ;;  %v3127_v25 = vstv %s964_s24 }
  0xd0   : > { %763 = vmatpush1.bf16.xpose.msra.mxu0 %v2370_v26  ;;  %v2455_v26 = vld [vmem:[#allocation9 + $0xdc] ss:$12 sps:$4 sm:$0xff]  }
  0xd1   : > { %764 = vmatprep.subr.bf16.mxu0 %v2371_v27  ;;  %v2457_v27 = vld [vmem:[#allocation9 + $0xd8] ss:$12 sps:$4 sm:$0xff]   ;;  %1544 = vmatprep.subr.bf16.mxu1 %v2455_v26 }
  0xd2   : > { %1545 = vmatpush1.bf16.msra.mxu1 %v2457_v27 }
  0xd8   : > { %765 = vmatpush1.bf16.xpose.msra.mxu0 %v2373_v28 }
  0xd9   : > { %766 = vmatprep.subr.bf16.mxu0 %v2374_v29 }
  0xe0   : > { %767 = vmatpush1.bf16.xpose.msra.mxu0 %v2376_v30 }
  0xe1   : > { %768 = vmatprep.subr.bf16.mxu0 %v2377_v31 }
  0xe8   : > { %769 = vmatpush1.bf16.xpose.msra.mxu0 %v2379_v32 }
  0xe9   : > { %2112 = vmatprep.subr.bf16.mxu0 %v2383_v33 }
  0xef   : > { %771 = vmatmul.mubr.bf16.vlgmr.msra.gmra.mrb[0].mxu0 %v2380_v34 }
  0xf0   : > { %2113 = vmatpush3.bf16.xpose.msra.mxu0 %v2384_v35  ;;  %780 = vmatprep.mubr.bf16.mxu0 %v2385_v36 }
  0xf1   : > { %2114 = vmatprep.subr.bf16.mxu0 %v2388_v37 }
  0xf7   : > { %781 = vmatmul.mubr.bf16.gmra.mrb[4].mxu0 %v2387_v38 }
  0xf8   : > { %2115 = vmatpush3.bf16.xpose.msra.mxu0 %v2389_v39  ;;  %790 = vmatprep.mubr.bf16.mxu0 %v2390_v40 }
  0xf9   : > { %2116 = vmatprep.subr.bf16.mxu0 %v2393_v41 }
  0xff   : > { %791 = vmatmul.mubr.bf16.gmra.mrb[8].mxu0 %v2392_v42  ;;  %v2458_v42 = vld [vmem:[#allocation9 + $0xf4] ss:$12 sps:$4 sm:$0xff]  }
 0x100   : > { %2117 = vmatpush3.bf16.xpose.msra.mxu0 %v2394_v43  ;;  %800 = vmatprep.mubr.bf16.mxu0 %v2395_v44 }
 0x101   : > { %2118 = vmatprep.subr.bf16.mxu0 %v2398_v45  ;;  %v2460_v45 = vld [vmem:[#allocation9 + $0xf0] ss:$12 sps:$4 sm:$0xff]   ;;  %1546 = vmatprep.subr.bf16.mxu1 %v2458_v42 }
 0x102   : > { %1547 = vmatpush1.bf16.msra.mxu1 %v2460_v45 }
 0x107   : > { %801 = vmatmul.mubr.bf16.gmra.mrb[12].mxu0 %v2397_v46 }
 0x108   : > { %2119 = vmatpush3.bf16.xpose.msra.mxu0 %v2399_v47  ;;  %810 = vmatprep.mubr.bf16.mxu0 %v2400_v48  ;;  %v2461_v48 = vld [vmem:[#allocation9 + $0x10c] ss:$12 sps:$4 sm:$0xff]  }
 0x109   : > { %2120 = vmatprep.subr.bf16.mxu0 %v2403_v49  ;;  %v2463_v49 = vld [vmem:[#allocation9 + $0x108] ss:$12 sps:$4 sm:$0xff]   ;;  %1548 = vmatprep.subr.bf16.mxu1 %v2461_v48 }
 0x10a   : > { %1549 = vmatpush1.bf16.msra.mxu1 %v2463_v49 }
 0x10f   : > { %811 = vmatmul.mubr.bf16.gmra.mrb[16].mxu0 %v2402_v50 }
 0x110   : > { %2121 = vmatpush3.bf16.xpose.msra.mxu0 %v2404_v51  ;;  %820 = vmatprep.mubr.bf16.mxu0 %v2405_v52  ;;  %v2464_v52 = vld [vmem:[#allocation9 + $0x124] ss:$12 sps:$4 sm:$0xff]  }
 0x111   : > { %2122 = vmatprep.subr.bf16.mxu0 %v2408_v53  ;;  %1550 = vmatprep.subr.bf16.mxu1 %v2464_v52 }
 0x117   : > { %821 = vmatmul.mubr.bf16.gmra.mrb[20].mxu0 %v2407_v54 }
 0x118   : > { %2123 = vmatpush3.bf16.xpose.msra.mxu0 %v2409_v55  ;;  %830 = vmatprep.mubr.bf16.mxu0 %v2410_v56  ;;  %v2466_v55 = vld [vmem:[#allocation9 + $0x120] ss:$12 sps:$4 sm:$0xff]  }
 0x119   : > { %2124 = vmatprep.subr.bf16.mxu0 %v2413_v57  ;;  %1551 = vmatpush1.bf16.msra.mxu1 %v2466_v55 }
 0x11f   : > { %831 = vmatmul.mubr.bf16.gmra.mrb[24].mxu0 %v2412_v58  ;;  %v2467_v58 = vld [vmem:[#allocation9 + $0x13c] ss:$12 sps:$4 sm:$0xff]  }
 0x120   : > { %2125 = vmatpush3.bf16.xpose.msra.mxu0 %v2414_v59  ;;  %840 = vmatprep.mubr.bf16.mxu0 %v2415_v60  ;;  %v2469_v59 = vld [vmem:[#allocation9 + $0x138] ss:$12 sps:$4 sm:$0xff]  }
 0x121   : > { %2126 = vmatprep.subr.bf16.mxu0 %v2418_v61  ;;  %1552 = vmatprep.subr.bf16.mxu1 %v2467_v58 }
 0x122   : > { %1553 = vmatpush1.bf16.msra.mxu1 %v2469_v59 }
 0x127   : > { %841 = vmatmul.mubr.bf16.gmra.mrb[28].mxu0 %v2417_v62  ;;  %v2470_v62 = vld [vmem:[#allocation9 + $0x154] ss:$12 sps:$4 sm:$0xff]  }
 0x128   : > { %2127 = vmatpush3.bf16.xpose.msra.mxu0 %v2419_v63  ;;  %2128 = vmatprep.mubr.bf16.mxu0 %v2420_v0 }
 0x129   : > { %1554 = vmatprep.subr.bf16.mxu1 %v2470_v62 }
 0x12f   : > { %2129 = vmatmul.mubr.bf16.vlgmr.msra.gmra.mrb[0].mxu0 %v2420_v0 }
 0x130   : > { %2130 = vmatprep.mubr.bf16.mxu0 %v2421_v1 }
 0x137   : > { %2131 = vmatmul.mubr.bf16.gmra.mrb[4].mxu0 %v2421_v1  ;;  %v2472_v1 = vld [vmem:[#allocation9 + $0x150] ss:$12 sps:$4 sm:$0xff]  }
 0x138   : > { %2132 = vmatprep.mubr.bf16.mxu0 %v2422_v2  ;;  %1555 = vmatpush1.bf16.msra.mxu1 %v2472_v1 }
 0x13f   : > { %2133 = vmatmul.mubr.bf16.gmra.mrb[8].mxu0 %v2422_v2 }
 0x140   : > { %2134 = vmatprep.mubr.bf16.mxu0 %v2423_v3 }
 0x147   : > { %2135 = vmatmul.mubr.bf16.gmra.mrb[12].mxu0 %v2423_v3 }
 0x148   : > { %2136 = vmatprep.mubr.bf16.mxu0 %v2424_v4 }
 0x14f   : > { %2137 = vmatmul.mubr.bf16.gmra.mrb[16].mxu0 %v2424_v4  ;;  %v2473_v4 = vld [vmem:[#allocation9 + $0x16c] ss:$12 sps:$4 sm:$0xff]  }
 0x150   : > { %2138 = vmatprep.mubr.bf16.mxu0 %v2425_v5  ;;  %1556 = vmatprep.subr.bf16.mxu1 %v2473_v4 }
 0x157   : > { %2139 = vmatmul.mubr.bf16.gmra.mrb[20].mxu0 %v2425_v5  ;;  %v2475_v5 = vld [vmem:[#allocation9 + $0x168] ss:$12 sps:$4 sm:$0xff]  }
 0x158   : > { %2140 = vmatprep.mubr.bf16.mxu0 %v2426_v6  ;;  %1557 = vmatpush1.bf16.msra.mxu1 %v2475_v5 }
 0x159   : > { %2144 = vmatprep.subr.bf16.mxu1 %v2476_v14 }
 0x15f   : > { %2141 = vmatmul.mubr.bf16.gmra.mrb[24].mxu0 %v2426_v6 }
 0x160   : > { %2142 = vmatprep.mubr.bf16.mxu0 %v2427_v7 }
 0x167   : > { %2143 = vmatmul.mubr.bf16.gmra.mrb[28].mxu0 %v2427_v7 }
 0x202   : > { %v3031_v28 = vpop.f32.mrb[0].mxu0 }
 0x203   : > { %v3033_v29 = vpop.f32.mrb[1].mxu0 }
 0x204   : > { %v3035_v30 = vpop.f32.mrb[2].mxu0  ;;  %v965_v31 = vmax.f32 %v3031_v28, %v3033_v29 }
 0x205   : > { %v3039_v32 = vpop.f32.mrb[3].mxu0 }
 0x206   : > { %966 = vmax.xlane.f32.xlu0 %v965_v31  ;;  %v968_v33 = vmax.f32 %v3035_v30, %v3039_v32 }
 0x20a   : > { %969 = vmax.xlane.f32.xlu0 %v968_v33  ;;  %v3043_v34 = vpop.f32.mrb[4].mxu0 }
 0x20b   : > { %v3045_v35 = vpop.f32.mrb[5].mxu0 }
 0x20c   : > { %v3047_v36 = vpop.f32.mrb[6].mxu0  ;;  %v971_v37 = vmax.f32 %v3043_v34, %v3045_v35 }
 0x20d   : > { %v3051_v38 = vpop.f32.mrb[7].mxu0 }
 0x20e   : > { %972 = vmax.xlane.f32.xlu1 %v971_v37  ;;  %v974_v39 = vmax.f32 %v3047_v36, %v3051_v38 }
 0x212   : > { %975 = vmax.xlane.f32.xlu1 %v974_v39  ;;  %v3055_v40 = vpop.f32.mrb[8].mxu0 }
 0x213   : > { %v3057_v41 = vpop.f32.mrb[9].mxu0 }
 0x214   : > { %v3059_v43 = vpop.f32.mrb[10].mxu0  ;;  %v977_v44 = vmax.f32 %v3055_v40, %v3057_v41 }
 0x215   : > { %v3063_v46 = vpop.f32.mrb[11].mxu0 }
 0x216   : > { %978 = vmax.xlane.f32.xlu0 %v977_v44  ;;  %v980_v47 = vmax.f32 %v3059_v43, %v3063_v46 }
 0x218   : > { %981 = vmax.xlane.f32.xlu1 %v980_v47 }
 0x21a   : > { %v3067_v50 = vpop.f32.mrb[12].mxu0 }
 0x21b   : > { %v3069_v51 = vpop.f32.mrb[13].mxu0 }
 0x21c   : > { %v3071_v53 = vpop.f32.mrb[14].mxu0  ;;  %v983_v54 = vmax.f32 %v3067_v50, %v3069_v51 }
 0x21d   : > { %v3075_v56 = vpop.f32.mrb[15].mxu0 }
 0x21e   : > { %984 = vmax.xlane.f32.xlu0 %v983_v54  ;;  %v986_v57 = vmax.f32 %v3071_v53, %v3075_v56 }
 0x220   : > { %987 = vmax.xlane.f32.xlu1 %v986_v57 }
 0x222   : > { %v3079_v60 = vpop.f32.mrb[16].mxu0 }
 0x223   : > { %v3081_v61 = vpop.f32.mrb[17].mxu0 }
 0x224   : > { %v3083_v63 = vpop.f32.mrb[18].mxu0  ;;  %v989_v0 = vmax.f32 %v3079_v60, %v3081_v61 }
 0x225   : > { %v3087_v2 = vpop.f32.mrb[19].mxu0 }
 0x226   : > { %990 = vmax.xlane.f32.xlu0 %v989_v0  ;;  %v992_v3 = vmax.f32 %v3083_v63, %v3087_v2 }
 0x228   : > { %993 = vmax.xlane.f32.xlu1 %v992_v3 }
 0x22a   : > { %v3091_v6 = vpop.f32.mrb[20].mxu0 }
 0x22b   : > { %v3093_v7 = vpop.f32.mrb[21].mxu0 }
 0x22c   : > { %v3095_v8 = vpop.f32.mrb[22].mxu0  ;;  %v995_v9 = vmax.f32 %v3091_v6, %v3093_v7 }
 0x22d   : > { %v3099_v10 = vpop.f32.mrb[23].mxu0 }
 0x22e   : > { %996 = vmax.xlane.f32.xlu0 %v995_v9  ;;  %v998_v11 = vmax.f32 %v3095_v8, %v3099_v10 }
 0x230   : > { %999 = vmax.xlane.f32.xlu1 %v998_v11 }
 0x232   : > { %v3103_v12 = vpop.f32.mrb[24].mxu0 }
 0x233   : > { %v3105_v13 = vpop.f32.mrb[25].mxu0 }
 0x234   : > { %v3107_v15 = vpop.f32.mrb[26].mxu0  ;;  %v1001_v16 = vmax.f32 %v3103_v12, %v3105_v13 }
 0x235   : > { %v3111_v17 = vpop.f32.mrb[27].mxu0 }
 0x236   : > { %1002 = vmax.xlane.f32.xlu0 %v1001_v16  ;;  %v1004_v18 = vmax.f32 %v3107_v15, %v3111_v17 }
 0x238   : > { %1005 = vmax.xlane.f32.xlu1 %v1004_v18 }
 0x23a   : > { %v3115_v19 = vpop.f32.mrb[28].mxu0 }
 0x23b   : > { %v3117_v20 = vpop.f32.mrb[29].mxu0 }
 0x23c   : > { %v3119_v21 = vpop.f32.mrb[30].mxu0  ;;  %v1007_v22 = vmax.f32 %v3115_v19, %v3117_v20 }
 0x23d   : > { %v3123_v23 = vpop.f32.mrb[31].mxu0 }
 0x23e   : > { %v1010_v24 = vmax.f32 %v3119_v21, %v3123_v23  ;;  %1008 = vmax.xlane.f32.xlu0 %v1007_v22 }
 0x240   : > { %1011 = vmax.xlane.f32.xlu1 %v1010_v24 }
 0x293   : > { %v967_v26 = vpop.xlane.xlu0 %966 }
 0x294   : > { %v1013_v27 = vsub.f32 %v3031_v28, %v967_v26  ;;  %v1014_v31 = vsub.f32 %v3033_v29, %v967_v26 }
 0x296   : > { %v1046_v33 = vmul.f32 %v3127_v25, %v1013_v27  ;;  %v1047_v37 = vmul.f32 %v3127_v25, %v1014_v31 }
 0x297   : > { %v970_v39 = vpop.xlane.xlu0 %969 }
 0x298   : > { %v1078_v42 = vmul.f32 1.442695, %v1046_v33  ;;  %v1080_v44 = vmul.f32 1.442695, %v1047_v37  ;;  %v1015_v45 = vsub.f32 %v3035_v30, %v970_v39  ;;  %v1016_v47 = vsub.f32 %v3039_v32, %v970_v39 }
 0x29a   : > { %2492 = vpow2.f32 %v1078_v42  ;;  %v1048_v48 = vmul.f32 %v3127_v25, %v1015_v45  ;;  %v1049_v49 = vmul.f32 %v3127_v25, %v1016_v47  ;;  %v2478_v47 = vld [vmem:[#allocation9 + $0xe0] ss:$12 sps:$4 sm:$0xff]  }
 0x29b   : > { %2494 = vpow2.f32 %v1080_v44  ;;  %v973_v28 = vpop.xlane.xlu1 %972  ;;  %v2477_v44 = vld [vmem:[#allocation9 + $0x8] ss:$12 sps:$4 sm:$0xff]  }
 0x29c   : > { %v1082_v52 = vmul.f32 1.442695, %v1048_v48  ;;  %v1084_v29 = vmul.f32 1.442695, %v1049_v49  ;;  %v1017_v54 = vsub.f32 %v3043_v34, %v973_v28  ;;  %v1018_v55 = vsub.f32 %v3045_v35, %v973_v28 }
 0x29e   : > { %2496 = vpow2.f32 %v1082_v52  ;;  %v1050_v57 = vmul.f32 %v3127_v25, %v1017_v54  ;;  %v1051_v30 = vmul.f32 %v3127_v25, %v1018_v55 }
 0x29f   : > { %2498 = vpow2.f32 %v1084_v29  ;;  %v976_v32 = vpop.xlane.xlu1 %975 }
 0x2a0   : > { %v1086_v58 = vmul.f32 1.442695, %v1050_v57  ;;  %v1088_v59 = vmul.f32 1.442695, %v1051_v30  ;;  %v1019_v62 = vsub.f32 %v3047_v36, %v976_v32  ;;  %v1020_v0 = vsub.f32 %v3051_v38, %v976_v32  ;;  %v2479_v32 = vld [vmem:[#allocation9 + $0x20] ss:$12 sps:$4 sm:$0xff]  }
 0x2a2   : > { %2500 = vpow2.f32 %v1086_v58  ;;  %v1052_v1 = vmul.f32 %v3127_v25, %v1019_v62  ;;  %v1053_v34 = vmul.f32 %v3127_v25, %v1020_v0 }
 0x2a3   : > { %2502 = vpow2.f32 %v1088_v59  ;;  %v979_v35 = vpop.xlane.xlu0 %978 }
 0x2a4   : > { %v2493_v3 = vpop.eup %2492  ;;  %v1090_v4 = vmul.f32 1.442695, %v1052_v1  ;;  %v1092_v5 = vmul.f32 1.442695, %v1053_v34  ;;  %v1021_v9 = vsub.f32 %v3055_v40, %v979_v35  ;;  %v1022_v11 = vsub.f32 %v3057_v41, %v979_v35 }
 0x2a5   : > { %v2495_v14 = vpop.eup %2494  ;;  %v982_v16 = vpop.xlane.xlu1 %981 }
 0x2a6   : > { %2504 = vpow2.f32 %v1090_v4  ;;  %v1054_v36 = vmul.f32 %v3127_v25, %v1021_v9  ;;  %v1055_v38 = vmul.f32 %v3127_v25, %v1022_v11  ;;  %v1023_v18 = vsub.f32 %v3059_v43, %v982_v16  ;;  %v2482_v11 = vld [vmem:[#allocation9 + $0x110] ss:$12 sps:$4 sm:$0xff]  }
 0x2a7   : > { %2506 = vpow2.f32 %v1092_v5  ;;  %v1024_v22 = vsub.f32 %v3063_v46, %v982_v16  ;;  %v1142_v24 = vadd.f32 %v2495_v14, %v2493_v3 }
 0x2a8   : > { %v2497_v26 = vpop.eup %2496  ;;  %v1094_v27 = vmul.f32 1.442695, %v1054_v36  ;;  %v1096_v31 = vmul.f32 1.442695, %v1055_v38  ;;  %v1056_v40 = vmul.f32 %v3127_v25, %v1023_v18 }
 0x2a9   : > { %v2499_v33 = vpop.eup %2498  ;;  %v1057_v41 = vmul.f32 %v3127_v25, %v1024_v22  ;;  %1143 = vadd.xlane.f32.xlu0 %v1142_v24  ;;  %v3153_v37 = vpack.c.bf16 %v2497_v26, %v2493_v3 }
 0x2aa   : > { %2508 = vpow2.f32 %v1094_v27  ;;  %v1098_v39 = vmul.f32 1.442695, %v1056_v40  ;;  %v3155_v42 = vpack.c.bf16 %v2499_v33, %v2495_v14  ;;  %v1145_v43 = vadd.f32 %v2499_v33, %v2497_v26  ;;  %v2483_v40 = vld [vmem:[#allocation9 + $0x50] ss:$12 sps:$4 sm:$0xff]  }
 0x2ab   : > { %2510 = vpow2.f32 %v1096_v31  ;;  %v1100_v46 = vmul.f32 1.442695, %v1057_v41  ;;  %v985_v45 = vpop.xlane.xlu0 %984 }
 0x2ac   : > { %v2501_v48 = vpop.eup %2500  ;;  %2512 = vpow2.f32 %v1098_v39  ;;  %1558 = vmatprep.mubr.bf16.mxu1 %v3155_v42  ;;  %v1025_v49 = vsub.f32 %v3067_v50, %v985_v45  ;;  %v1026_v28 = vsub.f32 %v3069_v51, %v985_v45  ;;  %1146 = vadd.xlane.f32.xlu1 %v1145_v43  ;;  %v2480_v50 = vld [vmem:[#allocation9 + $0xf8] ss:$12 sps:$4 sm:$0xff]  }
 0x2ad   : > { %v2503_v52 = vpop.eup %2502  ;;  %2514 = vpow2.f32 %v1100_v46  ;;  %1559 = vmatmul.mubr.bf16.vlgmr.msra.gmra.mrb[0].mxu1 %v3153_v37  ;;  %v988_v29 = vpop.xlane.xlu1 %987  ;;  %v2484_v46 = vld [vmem:[#allocation9 + $0x128] ss:$12 sps:$4 sm:$0xff]  }
 0x2ae   : > { %v1058_v54 = vmul.f32 %v3127_v25, %v1025_v49  ;;  %v1059_v55 = vmul.f32 %v3127_v25, %v1026_v28  ;;  %2145 = vmatpush3.bf16.msra.mxu1 %v2477_v44  ;;  %v1027_v57 = vsub.f32 %v3071_v53, %v988_v29  ;;  %v1028_v30 = vsub.f32 %v3075_v56, %v988_v29  ;;  %v2481_v56 = vld [vmem:[#allocation9 + $0x38] ss:$12 sps:$4 sm:$0xff]   ;;  %v2486_v28 = vld [vmem:[#allocation9 + $0x140] ss:$12 sps:$4 sm:$0xff]  }
 0x2af   : > { %v1148_v58 = vadd.f32 %v2503_v52, %v2501_v48  ;;  %2146 = vmatprep.subr.bf16.mxu1 %v2478_v47 }
 0x2b0   : > { %v2505_v51 = vpop.eup %2504  ;;  %v1102_v59 = vmul.f32 1.442695, %v1058_v54  ;;  %v1104_v62 = vmul.f32 1.442695, %v1059_v55  ;;  %v1060_v0 = vmul.f32 %v3127_v25, %v1027_v57  ;;  %v1061_v1 = vmul.f32 %v3127_v25, %v1028_v30 }
 0x2b1   : > { %v2507_v34 = vpop.eup %2506  ;;  %1149 = vadd.xlane.f32.xlu0 %v1148_v58  ;;  %v3167_v35 = vpack.c.bf16 %v2505_v51, %v2501_v48  ;;  %v2485_v48 = vld [vmem:[#allocation9 + $0x68] ss:$12 sps:$4 sm:$0xff]  }
 0x2b2   : > { %2516 = vpow2.f32 %v1102_v59  ;;  %v1106_v3 = vmul.f32 1.442695, %v1060_v0  ;;  %v1108_v53 = vmul.f32 1.442695, %v1061_v1  ;;  %v3169_v4 = vpack.c.bf16 %v2507_v34, %v2503_v52  ;;  %2147 = vmatpush3.bf16.msra.mxu1 %v2479_v32  ;;  %v2487_v59 = vld [vmem:[#allocation9 + $0x80] ss:$12 sps:$4 sm:$0xff]  }
 0x2b3   : > { %2518 = vpow2.f32 %v1104_v62  ;;  %v991_v5 = vpop.xlane.xlu0 %990  ;;  %v1151_v9 = vadd.f32 %v2507_v34, %v2505_v51  ;;  %2148 = vmatprep.subr.bf16.mxu1 %v2480_v50 }
 0x2b4   : > { %v2509_v14 = vpop.eup %2508  ;;  %2520 = vpow2.f32 %v1106_v3  ;;  %1568 = vmatprep.mubr.bf16.mxu1 %v3169_v4  ;;  %v1029_v16 = vsub.f32 %v3079_v60, %v991_v5  ;;  %v1030_v36 = vsub.f32 %v3081_v61, %v991_v5 }
 0x2b5   : > { %v2511_v38 = vpop.eup %2510  ;;  %2522 = vpow2.f32 %v1108_v53  ;;  %1152 = vadd.xlane.f32.xlu1 %v1151_v9  ;;  %1569 = vmatmul.mubr.bf16.gmra.mrb[4].mxu1 %v3167_v35  ;;  %v994_v18 = vpop.xlane.xlu1 %993  ;;  %v2488_v53 = vld [vmem:[#allocation9 + $0x158] ss:$12 sps:$4 sm:$0xff]  }
 0x2b6   : > { %v2513_v22 = vpop.eup %2512  ;;  %v1062_v24 = vmul.f32 %v3127_v25, %v1029_v16  ;;  %v1063_v26 = vmul.f32 %v3127_v25, %v1030_v36  ;;  %v1031_v27 = vsub.f32 %v3083_v63, %v994_v18  ;;  %v1032_v31 = vsub.f32 %v3087_v2, %v994_v18  ;;  %2149 = vmatpush3.bf16.msra.mxu1 %v2481_v56  ;;  %v2489_v9 = vld [vmem:[#allocation9 + $0x98] ss:$12 sps:$4 sm:$0xff]  }
 0x2b7   : > { %v2515_v60 = vpop.eup %2514  ;;  %v1154_v33 = vadd.f32 %v2511_v38, %v2509_v14  ;;  %v3179_v61 = vpack.c.bf16 %v2513_v22, %v2509_v14  ;;  %2150 = vmatprep.subr.bf16.mxu1 %v2482_v11  ;;  %v2490_v14 = vld [vmem:[#allocation9 + $0x170] ss:$12 sps:$4 sm:$0xff]  }
 0x2b8   : > { %v1110_v41 = vmul.f32 1.442695, %v1062_v24  ;;  %v1112_v39 = vmul.f32 1.442695, %v1063_v26  ;;  %v1064_v43 = vmul.f32 %v3127_v25, %v1031_v27  ;;  %v1065_v44 = vmul.f32 %v3127_v25, %v1032_v31 }
 0x2b9   : > { %1155 = vadd.xlane.f32.xlu0 %v1154_v33  ;;  %v3183_v45 = vpack.c.bf16 %v2515_v60, %v2511_v38  ;;  %v1157_v63 = vadd.f32 %v2515_v60, %v2513_v22  ;;  %v2491_v60 = vld [vmem:[#allocation9 + $0xb0] ss:$12 sps:$4 sm:$0xff]  }
 0x2ba   : > { %2524 = vpow2.f32 %v1110_v41  ;;  %v1114_v2 = vmul.f32 1.442695, %v1064_v43  ;;  %v1116_v47 = vmul.f32 1.442695, %v1065_v44  ;;  %2151 = vmatpush3.bf16.msra.mxu1 %v2483_v40 }
 0x2bb   : > { %2526 = vpow2.f32 %v1112_v39  ;;  %1578 = vmatprep.mubr.bf16.mxu1 %v3183_v45  ;;  %1158 = vadd.xlane.f32.xlu1 %v1157_v63  ;;  %v997_v49 = vpop.xlane.xlu0 %996 }
 0x2bc   : > { %v2517_v52 = vpop.eup %2516  ;;  %2528 = vpow2.f32 %v1114_v2  ;;  %v1033_v29 = vsub.f32 %v3091_v6, %v997_v49  ;;  %v1034_v54 = vsub.f32 %v3093_v7, %v997_v49  ;;  %2152 = vmatprep.subr.bf16.mxu1 %v2484_v46 }
 0x2bd   : > { %v2519_v55 = vpop.eup %2518  ;;  %2530 = vpow2.f32 %v1116_v47  ;;  %1579 = vmatmul.mubr.bf16.gmra.mrb[8].mxu1 %v3179_v61  ;;  %v1000_v57 = vpop.xlane.xlu1 %999 }
 0x2be   : > { %v2521_v30 = vpop.eup %2520  ;;  %v1066_v32 = vmul.f32 %v3127_v25, %v1033_v29  ;;  %v1067_v58 = vmul.f32 %v3127_v25, %v1034_v54  ;;  %v1035_v50 = vsub.f32 %v3095_v8, %v1000_v57  ;;  %v1036_v51 = vsub.f32 %v3099_v10, %v1000_v57  ;;  %2153 = vmatpush3.bf16.msra.mxu1 %v2485_v48 }
 0x2bf   : > { %v2523_v6 = vpop.eup %2522  ;;  %v1160_v62 = vadd.f32 %v2519_v55, %v2517_v52  ;;  %v3193_v7 = vpack.c.bf16 %v2521_v30, %v2517_v52  ;;  %2154 = vmatprep.subr.bf16.mxu1 %v2486_v28 }
 0x2c0   : > { %v1118_v0 = vmul.f32 1.442695, %v1066_v32  ;;  %v1120_v1 = vmul.f32 1.442695, %v1067_v58  ;;  %v1068_v34 = vmul.f32 %v3127_v25, %v1035_v50  ;;  %v1069_v3 = vmul.f32 %v3127_v25, %v1036_v51 }
 0x2c1   : > { %1161 = vadd.xlane.f32.xlu0 %v1160_v62  ;;  %v3197_v56 = vpack.c.bf16 %v2523_v6, %v2519_v55  ;;  %v1163_v8 = vadd.f32 %v2523_v6, %v2521_v30 }
 0x2c2   : > { %2532 = vpow2.f32 %v1118_v0  ;;  %v1122_v10 = vmul.f32 1.442695, %v1068_v34  ;;  %v1124_v5 = vmul.f32 1.442695, %v1069_v3  ;;  %2155 = vmatpush3.bf16.msra.mxu1 %v2487_v59 }
 0x2c3   : > { %2534 = vpow2.f32 %v1120_v1  ;;  %1588 = vmatprep.mubr.bf16.mxu1 %v3197_v56  ;;  %1164 = vadd.xlane.f32.xlu1 %v1163_v8  ;;  %v1003_v11 = vpop.xlane.xlu0 %1002 }
 0x2c4   : > { %v2525_v16 = vpop.eup %2524  ;;  %2536 = vpow2.f32 %v1122_v10  ;;  %v1037_v36 = vsub.f32 %v3103_v12, %v1003_v11  ;;  %v1038_v38 = vsub.f32 %v3105_v13, %v1003_v11  ;;  %2156 = vmatprep.subr.bf16.mxu1 %v2488_v53 }
 0x2c5   : > { %v2527_v18 = vpop.eup %2526  ;;  %2538 = vpow2.f32 %v1124_v5  ;;  %1589 = vmatmul.mubr.bf16.gmra.mrb[12].mxu1 %v3193_v7  ;;  %v1006_v22 = vpop.xlane.xlu1 %1005 }
 0x2c6   : > { %v2529_v24 = vpop.eup %2528  ;;  %v1070_v26 = vmul.f32 %v3127_v25, %v1037_v36  ;;  %v1071_v27 = vmul.f32 %v3127_v25, %v1038_v38  ;;  %v1039_v31 = vsub.f32 %v3107_v15, %v1006_v22  ;;  %v1040_v40 = vsub.f32 %v3111_v17, %v1006_v22  ;;  %2157 = vmatpush3.bf16.msra.mxu1 %v2489_v9 }
 0x2c7   : > { %v2531_v12 = vpop.eup %2530  ;;  %v1166_v33 = vadd.f32 %v2527_v18, %v2525_v16  ;;  %v3207_v13 = vpack.c.bf16 %v2529_v24, %v2525_v16  ;;  %2158 = vmatprep.subr.bf16.mxu1 %v2490_v14 }
 0x2c8   : > { %v1126_v41 = vmul.f32 1.442695, %v1070_v26  ;;  %v1128_v39 = vmul.f32 1.442695, %v1071_v27  ;;  %v1072_v43 = vmul.f32 %v3127_v25, %v1039_v31  ;;  %v1073_v44 = vmul.f32 %v3127_v25, %v1040_v40 }
 0x2c9   : > { %1167 = vadd.xlane.f32.xlu0 %v1166_v33  ;;  %v3211_v46 = vpack.c.bf16 %v2531_v12, %v2527_v18  ;;  %v1169_v63 = vadd.f32 %v2531_v12, %v2529_v24 }
 0x2ca   : > { %2540 = vpow2.f32 %v1126_v41  ;;  %v1130_v15 = vmul.f32 1.442695, %v1072_v43  ;;  %v1132_v17 = vmul.f32 1.442695, %v1073_v44  ;;  %2159 = vmatpush3.bf16.msra.mxu1 %v2491_v60 }
 0x2cb   : > { %2542 = vpow2.f32 %v1128_v39  ;;  %1598 = vmatprep.mubr.bf16.mxu1 %v3211_v46  ;;  %1170 = vadd.xlane.f32.xlu1 %v1169_v63  ;;  %v1009_v2 = vpop.xlane.xlu0 %1008 }
 0x2cc   : > { %v2533_v47 = vpop.eup %2532  ;;  %2544 = vpow2.f32 %v1130_v15  ;;  %v1041_v48 = vsub.f32 %v3115_v19, %v1009_v2  ;;  %v1042_v49 = vsub.f32 %v3117_v20, %v1009_v2 }
 0x2cd   : > { %v2535_v28 = vpop.eup %2534  ;;  %2546 = vpow2.f32 %v1132_v17  ;;  %1599 = vmatmul.mubr.bf16.gmra.mrb[16].mxu1 %v3207_v13  ;;  %v1012_v52 = vpop.xlane.xlu1 %1011 }
 0x2ce   : > { %v2537_v29 = vpop.eup %2536  ;;  %v1074_v54 = vmul.f32 %v3127_v25, %v1041_v48  ;;  %v1075_v55 = vmul.f32 %v3127_v25, %v1042_v49  ;;  %v1043_v57 = vsub.f32 %v3119_v21, %v1012_v52  ;;  %v1044_v30 = vsub.f32 %v3123_v23, %v1012_v52 }
 0x2cf   : > { %v2539_v32 = vpop.eup %2538  ;;  %v1172_v58 = vadd.f32 %v2535_v28, %v2533_v47  ;;  %v1200_v50 = vpack.c.bf16 %v2537_v29, %v2533_v47 }
 0x2d0   : > { %v1134_v19 = vmul.f32 1.442695, %v1074_v54  ;;  %v1136_v51 = vmul.f32 1.442695, %v1075_v55  ;;  %v1076_v20 = vmul.f32 %v3127_v25, %v1043_v57  ;;  %v1077_v59 = vmul.f32 %v3127_v25, %v1044_v30 }
 0x2d1   : > { %1173 = vadd.xlane.f32.xlu0 %v1172_v58  ;;  %v1201_v6 = vpack.c.bf16 %v2539_v32, %v2535_v28  ;;  %v1175_v62 = vadd.f32 %v2539_v32, %v2537_v29 }
 0x2d2   : > { %2548 = vpow2.f32 %v1134_v19  ;;  %v1138_v0 = vmul.f32 1.442695, %v1076_v20  ;;  %v1140_v1 = vmul.f32 1.442695, %v1077_v59 }
 0x2d3   : > { %2550 = vpow2.f32 %v1136_v51  ;;  %1608 = vmatprep.mubr.bf16.mxu1 %v1201_v6  ;;  %1176 = vadd.xlane.f32.xlu1 %v1175_v62 }
 0x2d4   : > { %v2541_v21 = vpop.eup %2540  ;;  %2552 = vpow2.f32 %v1138_v0 }
 0x2d5   : > { %v2543_v23 = vpop.eup %2542  ;;  %2554 = vpow2.f32 %v1140_v1  ;;  %1609 = vmatmul.mubr.bf16.gmra.mrb[20].mxu1 %v1200_v50 }
 0x2d6   : > { %v2545_v34 = vpop.eup %2544  ;;  %v1178_v3 = vadd.f32 %v2543_v23, %v2541_v21 }
 0x2d7   : > { %v2547_v53 = vpop.eup %2546  ;;  %v1202_v8 = vpack.c.bf16 %v2545_v34, %v2541_v21 }
 0x2d8   : > { %1179 = vadd.xlane.f32.xlu0 %v1178_v3  ;;  %v1203_v25 = vpack.c.bf16 %v2547_v53, %v2543_v23  ;;  %v1181_v10 = vadd.f32 %v2547_v53, %v2545_v34 }
 0x2da   : > { %1618 = vmatprep.mubr.bf16.mxu1 %v1203_v25  ;;  %1182 = vadd.xlane.f32.xlu1 %v1181_v10 }
 0x2dc   : > { %v2549_v5 = vpop.eup %2548 }
 0x2dd   : > { %v2551_v9 = vpop.eup %2550  ;;  %1619 = vmatmul.mubr.bf16.gmra.mrb[24].mxu1 %v1202_v8 }
 0x2de   : > { %v2553_v11 = vpop.eup %2552  ;;  %v1184_v14 = vadd.f32 %v2551_v9, %v2549_v5 }
 0x2df   : > { %v2555_v16 = vpop.eup %2554  ;;  %v1204_v36 = vpack.c.bf16 %v2553_v11, %v2549_v5 }
 0x2e0   : > { %1185 = vadd.xlane.f32.xlu0 %v1184_v14  ;;  %v1205_v38 = vpack.c.bf16 %v2555_v16, %v2551_v9  ;;  %v1187_v18 = vadd.f32 %v2555_v16, %v2553_v11 }
 0x2e2   : > { %1628 = vmatprep.mubr.bf16.mxu1 %v1205_v38  ;;  %1188 = vadd.xlane.f32.xlu1 %v1187_v18 }
 0x2e5   : > { %1629 = vmatmul.mubr.bf16.gmra.mrb[28].mxu1 %v1204_v36 }
 0x2e6   : > { %1671 = vmatprep.mubr.bf16.mxu1 %v3155_v42 }
 0x2ed   : > { %1672 = vmatmul.mubr.bf16.vlgmr.msra.gmra.mrb[32].mxu1 %v3153_v37 }
 0x2ee   : > { %1679 = vmatprep.mubr.bf16.mxu1 %v3169_v4 }
 0x2f5   : > { %1680 = vmatmul.mubr.bf16.gmra.mrb[36].mxu1 %v3167_v35 }
 0x2f6   : > { %1687 = vmatprep.mubr.bf16.mxu1 %v3183_v45 }
 0x2fd   : > { %1688 = vmatmul.mubr.bf16.gmra.mrb[40].mxu1 %v3179_v61 }
 0x2fe   : > { %1695 = vmatprep.mubr.bf16.mxu1 %v3197_v56 }
 0x305   : > { %1696 = vmatmul.mubr.bf16.gmra.mrb[44].mxu1 %v3193_v7 }
 0x306   : > { %1703 = vmatprep.mubr.bf16.mxu1 %v3211_v46 }
 0x30d   : > { %1704 = vmatmul.mubr.bf16.gmra.mrb[48].mxu1 %v3207_v13 }
 0x30e   : > { %1711 = vmatprep.mubr.bf16.mxu1 %v1201_v6 }
 0x315   : > { %1712 = vmatmul.mubr.bf16.gmra.mrb[52].mxu1 %v1200_v50 }
 0x316   : > { %1719 = vmatprep.mubr.bf16.mxu1 %v1203_v25 }
 0x31d   : > { %1720 = vmatmul.mubr.bf16.gmra.mrb[56].mxu1 %v1202_v8 }
 0x31e   : > { %1727 = vmatprep.mubr.bf16.mxu1 %v1205_v38 }
 0x325   : > { %1728 = vmatmul.mubr.bf16.gmra.mrb[60].mxu1 %v1204_v36 }
 0x336   : > { %v1144_v37 = vpop.xlane.xlu0 %1143 }
 0x337   : > { %2556 = vrcp.f32 %v1144_v37 }
 0x339   : > { %v1147_v42 = vpop.xlane.xlu1 %1146 }
 0x33a   : > { %2558 = vrcp.f32 %v1147_v42 }
 0x33e   : > { %v1150_v35 = vpop.xlane.xlu0 %1149 }
 0x33f   : > { %2560 = vrcp.f32 %v1150_v35 }
 0x341   : > { %v3234_v61 = vpop.eup %2556 }
 0x342   : > { %v1153_v4 = vpop.xlane.xlu1 %1152 }
 0x343   : > { %2562 = vrcp.f32 %v1153_v4 }
 0x344   : > { %v3237_v22 = vpop.eup %2558 }
 0x346   : > { %v1156_v27 = vpop.xlane.xlu0 %1155 }
 0x347   : > { %2564 = vrcp.f32 %v1156_v27 }
 0x348   : > { %v1159_v12 = vpop.xlane.xlu1 %1158 }
 0x349   : > { %v3248_v33 = vpop.eup %2560  ;;  %2566 = vrcp.f32 %v1159_v12 }
 0x34d   : > { %v3251_v43 = vpop.eup %2562 }
 0x34e   : > { %v1162_v63 = vpop.xlane.xlu0 %1161 }
 0x34f   : > { %2568 = vrcp.f32 %v1162_v63 }
 0x350   : > { %v1165_v47 = vpop.xlane.xlu1 %1164 }
 0x351   : > { %v3260_v48 = vpop.eup %2564  ;;  %2570 = vrcp.f32 %v1165_v47 }
 0x353   : > { %v3263_v29 = vpop.eup %2566 }
 0x356   : > { %v1168_v57 = vpop.xlane.xlu0 %1167 }
 0x357   : > { %2572 = vrcp.f32 %v1168_v57 }
 0x358   : > { %v1171_v50 = vpop.xlane.xlu1 %1170 }
 0x359   : > { %v3272_v19 = vpop.eup %2568  ;;  %2574 = vrcp.f32 %v1171_v50 }
 0x35b   : > { %v3275_v6 = vpop.eup %2570 }
 0x35e   : > { %v1174_v1 = vpop.xlane.xlu0 %1173 }
 0x35f   : > { %2576 = vrcp.f32 %v1174_v1 }
 0x360   : > { %v1177_v3 = vpop.xlane.xlu1 %1176 }
 0x361   : > { %v3284_v53 = vpop.eup %2572  ;;  %2578 = vrcp.f32 %v1177_v3 }
 0x363   : > { %v3287_v5 = vpop.eup %2574 }
 0x365   : > { %v1180_v14 = vpop.xlane.xlu0 %1179 }
 0x366   : > { %2580 = vrcp.f32 %v1180_v14 }
 0x367   : > { %v1183_v18 = vpop.xlane.xlu1 %1182 }
 0x368   : > { %2582 = vrcp.f32 %v1183_v18 }
 0x369   : > { %v3296_v37 = vpop.eup %2576 }
 0x380   : > { %v1560_v45 = vpop.f32.mrb[0].mxu1 }
 0x381   : > { %v1752_v7 = vmul.f32 %v3234_v61, %v1560_v45  ;;  %v1562_v56 = vpop.f32.mrb[1].mxu1  ;;  %v3299_v45 = vpop.eup %2578 }
 0x382   : > { %v1753_v24 = vmul.f32 %v3234_v61, %v1562_v56  ;;  %v1564_v26 = vpop.f32.mrb[2].mxu1 }
 0x383   : > { %1800 = vst [vmem:[%s3240_s28] sm:$0xff] %v1752_v7  ;;  %v1755_v31 = vmul.f32 %v3237_v22, %v1564_v26  ;;  %v1566_v40 = vpop.f32.mrb[3].mxu1 }
 0x384   : > { %1801 = vst [vmem:[%s3240_s28 + $0x8] sm:$0xff] %v1753_v24  ;;  %v1756_v60 = vmul.f32 %v3237_v22, %v1566_v40  ;;  %v1186_v24 = vpop.xlane.xlu0 %1185  ;;  %v1189_v40 = vpop.xlane.xlu1 %1188 }
 0x385   : > { %1803 = vst [vmem:[%s3240_s28 + $0x18] sm:$0xff] %v1755_v31  ;;  %2584 = vrcp.f32 %v1186_v24 }
 0x386   : > { %1804 = vst [vmem:[%s3240_s28 + $0x20] sm:$0xff] %v1756_v60  ;;  %v3308_v60 = vpop.eup %2580  ;;  %2586 = vrcp.f32 %v1189_v40 }
 0x388   : > { %v1570_v13 = vpop.f32.mrb[4].mxu1 }
 0x389   : > { %v1758_v41 = vmul.f32 %v3248_v33, %v1570_v13  ;;  %v1572_v39 = vpop.f32.mrb[5].mxu1 }
 0x38a   : > { %v1759_v44 = vmul.f32 %v3248_v33, %v1572_v39  ;;  %v1574_v46 = vpop.f32.mrb[6].mxu1  ;;  %v3311_v39 = vpop.eup %2582 }
 0x38b   : > { %1806 = vst [vmem:[%s3240_s28 + $0x30] sm:$0xff] %v1758_v41  ;;  %v1761_v15 = vmul.f32 %v3251_v43, %v1574_v46  ;;  %v1576_v17 = vpop.f32.mrb[7].mxu1 }
 0x38c   : > { %1807 = vst [vmem:[%s3240_s28 + $0x38] sm:$0xff] %v1759_v44  ;;  %v1762_v2 = vmul.f32 %v3251_v43, %v1576_v17 }
 0x38d   : > { %1809 = vst [vmem:[%s3240_s28 + $0x48] sm:$0xff] %v1761_v15 }
 0x38e   : > { %1810 = vst [vmem:[%s3240_s28 + $0x50] sm:$0xff] %v1762_v2 }
 0x38f   : > { %v3320_v2 = vpop.eup %2584 }
 0x390   : > { %v1580_v49 = vpop.f32.mrb[8].mxu1 }
 0x391   : > { %v1764_v28 = vmul.f32 %v3260_v48, %v1580_v49  ;;  %v1582_v52 = vpop.f32.mrb[9].mxu1 }
 0x392   : > { %v1765_v54 = vmul.f32 %v3260_v48, %v1582_v52  ;;  %v1584_v55 = vpop.f32.mrb[10].mxu1  ;;  %v3323_v52 = vpop.eup %2586 }
 0x393   : > { %1812 = vst [vmem:[%s3240_s28 + $0x60] sm:$0xff] %v1764_v28  ;;  %v1767_v30 = vmul.f32 %v3263_v29, %v1584_v55  ;;  %v1586_v32 = vpop.f32.mrb[11].mxu1 }
 0x394   : > { %1813 = vst [vmem:[%s3240_s28 + $0x68] sm:$0xff] %v1765_v54  ;;  %v1768_v58 = vmul.f32 %v3263_v29, %v1586_v32 }
 0x395   : > { %1815 = vst [vmem:[%s3240_s28 + $0x78] sm:$0xff] %v1767_v30 }
 0x396   : > { %1816 = vst [vmem:[%s3240_s28 + $0x80] sm:$0xff] %v1768_v58 }
 0x398   : > { %v1590_v51 = vpop.f32.mrb[12].mxu1 }
 0x399   : > { %v1770_v20 = vmul.f32 %v3272_v19, %v1590_v51  ;;  %v1592_v59 = vpop.f32.mrb[13].mxu1 }
 0x39a   : > { %v1771_v62 = vmul.f32 %v3272_v19, %v1592_v59  ;;  %v1594_v0 = vpop.f32.mrb[14].mxu1 }
 0x39b   : > { %1818 = vst [vmem:[%s3240_s28 + $0x90] sm:$0xff] %v1770_v20  ;;  %v1773_v21 = vmul.f32 %v3275_v6, %v1594_v0  ;;  %v1596_v23 = vpop.f32.mrb[15].mxu1 }
 0x39c   : > { %1819 = vst [vmem:[%s3240_s28 + $0x98] sm:$0xff] %v1771_v62  ;;  %v1774_v34 = vmul.f32 %v3275_v6, %v1596_v23 }
 0x39d   : > { %1821 = vst [vmem:[%s3240_s28 + $0xa8] sm:$0xff] %v1773_v21 }
 0x39e   : > { %1822 = vst [vmem:[%s3240_s28 + $0xb0] sm:$0xff] %v1774_v34 }
 0x3a0   : > { %v1600_v8 = vpop.f32.mrb[16].mxu1 }
 0x3a1   : > { %v1776_v25 = vmul.f32 %v3284_v53, %v1600_v8  ;;  %v1602_v10 = vpop.f32.mrb[17].mxu1 }
 0x3a2   : > { %v1777_v9 = vmul.f32 %v3284_v53, %v1602_v10  ;;  %v1604_v11 = vpop.f32.mrb[18].mxu1 }
 0x3a3   : > { %1824 = vst [vmem:[%s3240_s28 + $0xc0] sm:$0xff] %v1776_v25  ;;  %v1779_v16 = vmul.f32 %v3287_v5, %v1604_v11  ;;  %v1606_v36 = vpop.f32.mrb[19].mxu1 }
 0x3a4   : > { %1825 = vst [vmem:[%s3240_s28 + $0xc8] sm:$0xff] %v1777_v9  ;;  %v1780_v38 = vmul.f32 %v3287_v5, %v1606_v36 }
 0x3a5   : > { %1827 = vst [vmem:[%s3240_s28 + $0xd8] sm:$0xff] %v1779_v16 }
 0x3a6   : > { %1828 = vst [vmem:[%s3240_s28 + $0xe0] sm:$0xff] %v1780_v38 }
 0x3a8   : > { %v1610_v42 = vpop.f32.mrb[20].mxu1 }
 0x3a9   : > { %v1782_v35 = vmul.f32 %v3296_v37, %v1610_v42  ;;  %v1612_v4 = vpop.f32.mrb[21].mxu1 }
 0x3aa   : > { %v1783_v7 = vmul.f32 %v3296_v37, %v1612_v4  ;;  %v1614_v56 = vpop.f32.mrb[22].mxu1 }
 0x3ab   : > { %1830 = vst [vmem:[%s3240_s28 + $0xf0] sm:$0xff] %v1782_v35  ;;  %v1785_v26 = vmul.f32 %v3299_v45, %v1614_v56  ;;  %v1616_v27 = vpop.f32.mrb[23].mxu1 }
 0x3ac   : > { %1831 = vst [vmem:[%s3240_s28 + $0xf8] sm:$0xff] %v1783_v7  ;;  %v1786_v31 = vmul.f32 %v3299_v45, %v1616_v27 }
 0x3ad   : > { %1833 = vst [vmem:[%s3240_s28 + $0x108] sm:$0xff] %v1785_v26 }
 0x3ae   : > { %1834 = vst [vmem:[%s3240_s28 + $0x110] sm:$0xff] %v1786_v31 }
 0x3b0   : > { %v1620_v12 = vpop.f32.mrb[24].mxu1 }
 0x3b1   : > { %v1788_v13 = vmul.f32 %v3308_v60, %v1620_v12  ;;  %v1622_v41 = vpop.f32.mrb[25].mxu1 }
 0x3b2   : > { %v1789_v44 = vmul.f32 %v3308_v60, %v1622_v41  ;;  %v1624_v46 = vpop.f32.mrb[26].mxu1 }
 0x3b3   : > { %1836 = vst [vmem:[%s3240_s28 + $0x120] sm:$0xff] %v1788_v13  ;;  %v1791_v63 = vmul.f32 %v3311_v39, %v1624_v46  ;;  %v1626_v15 = vpop.f32.mrb[27].mxu1 }
 0x3b4   : > { %1837 = vst [vmem:[%s3240_s28 + $0x128] sm:$0xff] %v1789_v44  ;;  %v1792_v17 = vmul.f32 %v3311_v39, %v1626_v15 }
 0x3b5   : > { %1839 = vst [vmem:[%s3240_s28 + $0x138] sm:$0xff] %v1791_v63 }
 0x3b6   : > { %1840 = vst [vmem:[%s3240_s28 + $0x140] sm:$0xff] %v1792_v17 }
 0x3b8   : > { %v1630_v47 = vpop.f32.mrb[28].mxu1 }
 0x3b9   : > { %v1794_v49 = vmul.f32 %v3320_v2, %v1630_v47  ;;  %v1632_v28 = vpop.f32.mrb[29].mxu1 }
 0x3ba   : > { %v1795_v54 = vmul.f32 %v3320_v2, %v1632_v28  ;;  %v1634_v55 = vpop.f32.mrb[30].mxu1 }
 0x3bb   : > { %1842 = vst [vmem:[%s3240_s28 + $0x150] sm:$0xff] %v1794_v49  ;;  %v1797_v57 = vmul.f32 %v3323_v52, %v1634_v55  ;;  %v1636_v30 = vpop.f32.mrb[31].mxu1 }
 0x3bc   : > { %1843 = vst [vmem:[%s3240_s28 + $0x158] sm:$0xff] %v1795_v54  ;;  %v1798_v32 = vmul.f32 %v3323_v52, %v1636_v30 }
 0x3bd   : > { %1845 = vst [vmem:[%s3240_s28 + $0x168] sm:$0xff] %v1797_v57 }
 0x3be   : > { %1846 = vst [vmem:[%s3240_s28 + $0x170] sm:$0xff] %v1798_v32 }
 0x3c0   : > { %v2160_v58 = vpop.f32.mrb[32].mxu1 }
 0x3c1   : > { %v2161_v50 = vpop.f32.mrb[33].mxu1 }
 0x3c2   : > { %v2162_v51 = vadd.f32 %v2161_v50, %v2160_v58  ;;  %v2163_v20 = vpop.f32.mrb[34].mxu1 }
 0x3c3   : > { %v2164_v59 = vpop.f32.mrb[35].mxu1 }
 0x3c4   : > { %v1754_v62 = vmul.f32 %v3234_v61, %v2162_v51  ;;  %v2165_v0 = vadd.f32 %v2164_v59, %v2163_v20 }
 0x3c6   : > { %1802 = vst [vmem:[%s3240_s28 + $0x10] sm:$0xff] %v1754_v62  ;;  %v1757_v1 = vmul.f32 %v3237_v22, %v2165_v0 }
 0x3c8   : > { %1805 = vst [vmem:[%s3240_s28 + $0x28] sm:$0xff] %v1757_v1  ;;  %v2166_v21 = vpop.f32.mrb[36].mxu1 }
 0x3c9   : > { %v2167_v23 = vpop.f32.mrb[37].mxu1 }
 0x3ca   : > { %v2168_v34 = vadd.f32 %v2167_v23, %v2166_v21  ;;  %v2169_v3 = vpop.f32.mrb[38].mxu1 }
 0x3cb   : > { %v2170_v8 = vpop.f32.mrb[39].mxu1 }
 0x3cc   : > { %v1760_v25 = vmul.f32 %v3248_v33, %v2168_v34  ;;  %v2171_v10 = vadd.f32 %v2170_v8, %v2169_v3 }
 0x3ce   : > { %1808 = vst [vmem:[%s3240_s28 + $0x40] sm:$0xff] %v1760_v25  ;;  %v1763_v9 = vmul.f32 %v3251_v43, %v2171_v10 }
 0x3d0   : > { %1811 = vst [vmem:[%s3240_s28 + $0x58] sm:$0xff] %v1763_v9  ;;  %v2172_v61 = vpop.f32.mrb[40].mxu1 }
 0x3d1   : > { %v2173_v11 = vpop.f32.mrb[41].mxu1 }
 0x3d2   : > { %v2174_v14 = vadd.f32 %v2173_v11, %v2172_v61  ;;  %v2175_v22 = vpop.f32.mrb[42].mxu1 }
 0x3d3   : > { %v2176_v16 = vpop.f32.mrb[43].mxu1 }
 0x3d4   : > { %v1766_v36 = vmul.f32 %v3260_v48, %v2174_v14  ;;  %v2177_v38 = vadd.f32 %v2176_v16, %v2175_v22 }
 0x3d6   : > { %1814 = vst [vmem:[%s3240_s28 + $0x70] sm:$0xff] %v1766_v36  ;;  %v1769_v18 = vmul.f32 %v3263_v29, %v2177_v38 }
 0x3d8   : > { %1817 = vst [vmem:[%s3240_s28 + $0x88] sm:$0xff] %v1769_v18  ;;  %v2178_v33 = vpop.f32.mrb[44].mxu1 }
 0x3d9   : > { %v2179_v42 = vpop.f32.mrb[45].mxu1 }
 0x3da   : > { %v2180_v35 = vadd.f32 %v2179_v42, %v2178_v33  ;;  %v2181_v43 = vpop.f32.mrb[46].mxu1 }
 0x3db   : > { %v2182_v4 = vpop.f32.mrb[47].mxu1 }
 0x3dc   : > { %v1772_v7 = vmul.f32 %v3272_v19, %v2180_v35  ;;  %v2183_v56 = vadd.f32 %v2182_v4, %v2181_v43 }
 0x3de   : > { %1820 = vst [vmem:[%s3240_s28 + $0xa0] sm:$0xff] %v1772_v7  ;;  %v1775_v24 = vmul.f32 %v3275_v6, %v2183_v56 }
 0x3e0   : > { %1823 = vst [vmem:[%s3240_s28 + $0xb8] sm:$0xff] %v1775_v24  ;;  %v2184_v48 = vpop.f32.mrb[48].mxu1 }
 0x3e1   : > { %v2185_v26 = vpop.f32.mrb[49].mxu1 }
 0x3e2   : > { %v2186_v27 = vadd.f32 %v2185_v26, %v2184_v48  ;;  %v2187_v29 = vpop.f32.mrb[50].mxu1 }
 0x3e3   : > { %v2188_v31 = vpop.f32.mrb[51].mxu1 }
 0x3e4   : > { %v1778_v40 = vmul.f32 %v3284_v53, %v2186_v27  ;;  %v2189_v12 = vadd.f32 %v2188_v31, %v2187_v29 }
 0x3e6   : > { %1826 = vst [vmem:[%s3240_s28 + $0xd0] sm:$0xff] %v1778_v40  ;;  %v1781_v13 = vmul.f32 %v3287_v5, %v2189_v12 }
 0x3e8   : > { %1829 = vst [vmem:[%s3240_s28 + $0xe8] sm:$0xff] %v1781_v13  ;;  %v2190_v19 = vpop.f32.mrb[52].mxu1 }
 0x3e9   : > { %v2191_v41 = vpop.f32.mrb[53].mxu1 }
 0x3ea   : > { %v2192_v44 = vadd.f32 %v2191_v41, %v2190_v19  ;;  %v2193_v6 = vpop.f32.mrb[54].mxu1 }
 0x3eb   : > { %v2194_v46 = vpop.f32.mrb[55].mxu1 }
 0x3ec   : > { %v1784_v63 = vmul.f32 %v3296_v37, %v2192_v44  ;;  %v2195_v15 = vadd.f32 %v2194_v46, %v2193_v6 }
 0x3ee   : > { %1832 = vst [vmem:[%s3240_s28 + $0x100] sm:$0xff] %v1784_v63  ;;  %v1787_v17 = vmul.f32 %v3299_v45, %v2195_v15 }
 0x3f0   : > { %1835 = vst [vmem:[%s3240_s28 + $0x118] sm:$0xff] %v1787_v17  ;;  %v2196_v53 = vpop.f32.mrb[56].mxu1 }
 0x3f1   : > { %v2197_v47 = vpop.f32.mrb[57].mxu1 }
 0x3f2   : > { %v2198_v5 = vadd.f32 %v2197_v47, %v2196_v53  ;;  %v2199_v49 = vpop.f32.mrb[58].mxu1 }
 0x3f3   : > { %v2200_v28 = vpop.f32.mrb[59].mxu1 }
 0x3f4   : > { %v1790_v54 = vmul.f32 %v3308_v60, %v2198_v5  ;;  %v2201_v55 = vadd.f32 %v2200_v28, %v2199_v49 }
 0x3f6   : > { %1838 = vst [vmem:[%s3240_s28 + $0x130] sm:$0xff] %v1790_v54  ;;  %v1793_v37 = vmul.f32 %v3311_v39, %v2201_v55 }
 0x3f8   : > { %1841 = vst [vmem:[%s3240_s28 + $0x148] sm:$0xff] %v1793_v37  ;;  %v2202_v57 = vpop.f32.mrb[60].mxu1 }
 0x3f9   : > { %v2203_v30 = vpop.f32.mrb[61].mxu1 }
 0x3fa   : > { %v2204_v45 = vadd.f32 %v2203_v30, %v2202_v57  ;;  %v2205_v32 = vpop.f32.mrb[62].mxu1 }
 0x3fb   : > { %v2206_v58 = vpop.f32.mrb[63].mxu1 }
 0x3fc   : > { %v1796_v50 = vmul.f32 %v3320_v2, %v2204_v45  ;;  %v2207_v51 = vadd.f32 %v2206_v58, %v2205_v32 }
 0x3fe   : > { %1844 = vst [vmem:[%s3240_s28 + $0x160] sm:$0xff] %v1796_v50  ;;  %v1799_v60 = vmul.f32 %v3323_v52, %v2207_v51 }
 0x400   : > { %1847 = vst [vmem:[%s3240_s28 + $0x178] sm:$0xff] %v1799_v60 }
 0x401   : > { %2687 = shalt.err (!%p2684_p2)
}
 0x402   : > { %s2688_s7 = scalar_lea.hbm %s3366_s14, 6144  ;;  %s2692_s25 = scalar_lea.hbm %s3424_s4, 12288 }
 0x403   : > { %p2689_p0 = scmp.ne.s32.totalorder %s3366_s14, %s2688_s7  ;;  %p2693_p6 = scmp.lt.u32.totalorder %s3366_s14, %s3424_s4 }
 0x404   : > { %p2694_p7 = scmp.lt.u32.totalorder %s2692_s25, %s2688_s7  ;;  %p2696_p8 = scmp.lt.u32.totalorder %s2688_s7, %s3366_s14 }
 0x405   : > { %p2690_p4 = pnand %p2689_p0, %p3439_p12 }
 0x406   : > { %p2695_p11 = por %p2694_p7, %p2693_p6 }
 0x407   : > { %p2691_p13 = pneg %p2690_p4 }
 0x408   : > { %p2697_p1 = por %p2696_p8, %p2695_p11 }
 0x40a   : > { %p2698_p10 = pnand %p2697_p1, %p2691_p13 }
 0x40c   : > { %2701 = shalt.err (!%p2698_p10)
}
 0x40d   : > { %s2768_s28 = smov 384   ;;  %s2769_s16 = smov 24  }
 0x40e   : > { %2255 = dma.vmem_to_hbm [thread:$0]  (%p3439_p12), %s3368_s0, 6144, %s3366_s14, %s1849_s20, %s2768_s28, %s2768_s28, %s2769_s16  }
 0x40f PF: > { %s1880_s9 = sand.u32 1, %s2740_s17   ;;  %p3440_p3 = scmp.ne.s32.totalorder %s3432_s27, 0 }
 0x410   : > { %p3441_p5 = scmp.ge.s32.totalorder %s2760_s22, 2  ;;  %s1881_s13 = scalar_lea.sflag [#allocation6], %s1880_s9 }
 0x412   : > { %p2269_p9 = pnand %p3441_p5, %p3440_p3 }
 0x414   : > { %2735 = dma.done.wait (!%p2269_p9), %s1881_s13, 6144  }
 0x415   : > { %2737 = vsyncadd (!%p2269_p9), %s1881_s13, 4294961152  ;;  %s22_s22 = sadd.s32 1, %s2760_s22   ;;  %s3442_s17 = smov %s2744_s18 }
 0x416   : > { %p19_p2 = scmp.ge.s32.totalorder %s22_s22, 4   ;;  %s3443_s18 = smov %s2748_s19 }
 0x417   : > { %s3444_s19 = smov %s2949_s10  ;;  %s3445_s20 = smov %s2756_s21 }
 0x418   : > { %s3446_s21 = smov %s3448_s5  ;;  %21 = sbr.rel (!%p19_p2) target bundleno = 9 (0x9), region = 87 }
 0x41f   :  { %1886 = vsyncpa [#allocation5], 1 }
 0x420   :  { %1888 = vsyncpa [#allocation5 + $0x1], 1 }
 0x421   :  { %1889 = vsyncpa [#allocation8], 1 }
 0x422   :  { %1890 = vsyncpa [#allocation6], 1 }
 0x423   :  { %1892 = vsyncpa [#allocation6 + $0x1], 1 }

</bundles_post_ra>
